<compile_context>
chip_gen: v6e
topology: v6e:2x2x1
jax: 0.10.0
libtpu: 0.0.40
codegen_flags: <defaults>
</compile_context>

<pallas_src>
import numpy as np
import jax
import jax.numpy as jnp
from jax import lax
from jax.experimental import pallas as pl
from jax.experimental.pallas import tpu as pltpu  # noqa: F401  (TPU backend)


# ----------------------------------------------------------------------------
# Gate / layer unitary construction (parameter setup glue, plain numpy)
# ----------------------------------------------------------------------------
_I2 = np.eye(2, dtype=np.complex128)
_X = np.array([[0.0, 1.0], [1.0, 0.0]], dtype=np.complex128)


def _rx(theta):
    c, s = np.cos(theta / 2.0), np.sin(theta / 2.0)
    return np.array([[c, -1j * s], [-1j * s, c]], dtype=np.complex128)


def _ry(theta):
    c, s = np.cos(theta / 2.0), np.sin(theta / 2.0)
    return np.array([[c, -s], [s, c]], dtype=np.complex128)


def _kron_all(mats):
    out = mats[0]
    for m in mats[1:]:
        out = np.kron(out, m)
    return out


def _parallel_gate_unitary(gate_fn, thetas):
    return _kron_all([gate_fn(t) for t in thetas])


def _xx_pair_operator(n_qubit, qa, qb):
    mats = [_X if q in (qa, qb) else _I2 for q in range(n_qubit)]
    return _kron_all(mats)


def _ms_xx_layer_unitary(n_qubit, thetas):
    dim = 2 ** n_qubit
    u = np.eye(dim, dtype=np.complex128)
    for q in range(n_qubit):
        qa, qb = q, (q + 1) % n_qubit
        xx = _xx_pair_operator(n_qubit, qa, qb)
        c, s = np.cos(thetas[q] / 2.0), np.sin(thetas[q] / 2.0)
        gate = c * np.eye(dim, dtype=np.complex128) - 1j * s * xx
        u = gate @ u
    return u


def build_decoder_layer_mats(n_qubit, k, key, weights_dtype=jnp.float32):
    """Deterministically init per-layer angles and build layer matrices.

    Returns:
      w_big: (L, 2D, 2D) block-complex packed weights  [[Wr, Wi], [-Wi, Wr]]
             with W = U^T (row-vector convention), dtype `weights_dtype`.
      w_re, w_im: (L, D, D) float32 real/imag of W, for the pure-JAX reference.
    """
    layer_kinds = ["rx", "ry", "rx"]          # preparation_layer
    for _ in range(k):
        layer_kinds += ["ms_xx", "ry"]        # self.layers

    keys = jax.random.split(key, len(layer_kinds))
    w_big, w_re, w_im = [], [], []
    for kind, kk in zip(layer_kinds, keys):
        thetas = np.asarray(
            jax.device_get(jax.random.normal(kk, (n_qubit,), dtype=jnp.float32)),
            dtype=np.float64,
        )
        if kind == "rx":
            u = _parallel_gate_unitary(_rx, thetas)
        elif kind == "ry":
            u = _parallel_gate_unitary(_ry, thetas)
        else:
            u = _ms_xx_layer_unitary(n_qubit, thetas)
        w = u.T  # row-vector convention: Y = X @ U^T
        wr = np.real(w).astype(np.float32)
        wi = np.imag(w).astype(np.float32)
        w_re.append(wr)
        w_im.append(wi)
        # [re|im] @ [[Wr, Wi], [-Wi, Wr]] == [re@Wr - im@Wi | re@Wi + im@Wr]
        w_big.append(np.block([[wr, wi], [-wi, wr]]).astype(np.float32))
    return (jnp.asarray(np.stack(w_big), dtype=weights_dtype),
            jnp.asarray(np.stack(w_re)),
            jnp.asarray(np.stack(w_im)))


# ----------------------------------------------------------------------------
# Pallas kernel: fully-unrolled chain of block-complex matmuls
# ----------------------------------------------------------------------------
def _decoder_kernel(w_ref, x_ref, y_ref, p_ref):
    num_layers = w_ref.shape[0]          # static
    d = y_ref.shape[-1]                  # Hilbert dim D (static)
    compute_dtype = w_ref.dtype

    # Pack the (re, im) state into one (B, 2D) block-complex row vector.
    xb = jnp.concatenate([x_ref[0], x_ref[1]], axis=-1)

    # Statically unrolled layer chain: one (B,2D)@(2D,2D) MXU pass per layer,
    # always accumulating in f32.
    for l in range(num_layers):
        lhs = xb if compute_dtype == jnp.float32 else xb.astype(compute_dtype)
        xb = jnp.dot(lhs, w_ref[l], preferred_element_type=jnp.float32)

    re = xb[:, :d]
    im = xb[:, d:]
    y_ref[0] = re
    y_ref[1] = im
    # Fused probabilities (free VPU epilogue): |amplitude|^2.
    p_ref[...] = re * re + im * im


def _run_decoder(x, w_big):
    """x: (2, B, D) float32, w_big: (L, 2D, 2D) -> ((2, B, D) state, (B, D) probs)."""
    two, B, D = x.shape
    assert two == 2 and w_big.shape[-1] == 2 * D and w_big.shape[-2] == 2 * D
    y, probs = pl.pallas_call(
        _decoder_kernel,
        out_shape=(jax.ShapeDtypeStruct((2, B, D), jnp.float32),
                   jax.ShapeDtypeStruct((B, D), jnp.float32)),
        # No grid: the whole problem (~1.8 MiB of weights + tiny state) fits in
        # VMEM as full-array blocks; a size-1 grid would only add buffering cost.
    )(w_big, x)
    return y, probs


def decoder_forward(x, w_big):
    """Evolved state, shape (2, B, D) float32."""
    y, _ = _run_decoder(x, w_big)
    return y


def decoder_forward_prob(x, w_big):
    """Probabilities |psi|^2, shape (B, D) float32 (computed inside the kernel)."""
    _, probs = _run_decoder(x, w_big)
    return probs


# ----------------------------------------------------------------------------
# Pure-JAX reference (for correctness check)
# ----------------------------------------------------------------------------
def decoder_forward_ref(x, w_re, w_im):
    re, im = x[0], x[1]
    hi = lax.Precision.HIGHEST
    for l in range(w_re.shape[0]):
        wr, wi = w_re[l], w_im[l]
        new_re = jnp.dot(re, wr, precision=hi) - jnp.dot(im, wi, precision=hi)
        new_im = jnp.dot(re, wi, precision=hi) + jnp.dot(im, wr, precision=hi)
        re, im = new_re, new_im
    return jnp.stack([re, im], axis=0)


# ----------------------------------------------------------------------------
if __name__ == "__main__":
    n_qubit = 7          # D = 2**7 = 128 -> 2D = 256 matches the MXU width
    k = 2                # -> 3 + 2*k = 7 circuit layers
    B = 8                # batch of input states
    D = 2 ** n_qubit

    key = jax.random.PRNGKey(0)
    k_params, k_re, k_im = jax.random.split(key, 3)

    # Deterministic parameter init (angles) -> packed per-layer unitaries.
    # (Use weights_dtype=jnp.bfloat16 on v6e/v7x for extra MXU throughput.)
    w_big, w_re, w_im = build_decoder_layer_mats(
        n_qubit, k, k_params, weights_dtype=jnp.float32)

    # Deterministic input: batch of random normalized complex states, (2,B,D).
    x_re = jax.random.normal(k_re, (B, D), dtype=jnp.float32)
    x_im = jax.random.normal(k_im, (B, D), dtype=jnp.float32)
    norm = jnp.sqrt(jnp.sum(x_re ** 2 + x_im ** 2, axis=-1, keepdims=True))
    x = jnp.stack([x_re / norm, x_im / norm], axis=0)

    y = jax.block_until_ready(decoder_forward(x, w_big))
    probs = jax.block_until_ready(decoder_forward_prob(x, w_big))

    # Sanity checks: match pure-JAX reference, and unitarity (probs sum to 1).
    y_ref = decoder_forward_ref(x, w_re, w_im)
    assert y.shape == (2, B, D) and y.dtype == jnp.float32
    assert probs.shape == (B, D) and probs.dtype == jnp.float32
    assert np.allclose(np.asarray(y), np.asarray(y_ref), rtol=2e-2, atol=2e-2)
    assert np.allclose(np.asarray(jnp.sum(probs, axis=-1)), 1.0, atol=1e-2)
    assert np.allclose(np.asarray(probs),
                       np.asarray(y[0] ** 2 + y[1] ** 2), rtol=1e-4, atol=1e-5)

    print("KERNEL_OK")
</pallas_src>

<mosaic_0001>
module attributes {stable_mosaic.version = 11 : i64} {
  func.func @_decoder_kernel(%arg0: memref<7x256x256xf32, #tpu.memory_space<vmem>>, %arg1: memref<2x8x128xf32, #tpu.memory_space<vmem>>, %arg2: memref<2x8x128xf32, #tpu.memory_space<vmem>>, %arg3: memref<8x128xf32, #tpu.memory_space<vmem>>) attributes {dimension_semantics = [], scalar_prefetch = 0 : i64, scratch_operands = 0 : i64, tpu.core_type = #tpu.core_type<tc>} {
    %c0 = arith.constant 0 : index
    %c0_0 = arith.constant 0 : index
    %c0_1 = arith.constant 0 : index
    %0 = vector.load %arg1[%c0, %c0_0, %c0_1] : memref<2x8x128xf32, #tpu.memory_space<vmem>>, vector<1x8x128xf32>
    %1 = vector.shape_cast %0 : vector<1x8x128xf32> to vector<8x128xf32>
    %c1 = arith.constant 1 : index
    %c0_2 = arith.constant 0 : index
    %c0_3 = arith.constant 0 : index
    %2 = vector.load %arg1[%c1, %c0_2, %c0_3] : memref<2x8x128xf32, #tpu.memory_space<vmem>>, vector<1x8x128xf32>
    %3 = vector.shape_cast %2 : vector<1x8x128xf32> to vector<8x128xf32>
    %4 = tpu.concatenate %1, %3 in 1 : vector<8x128xf32>, vector<8x128xf32> -> vector<8x256xf32>
    %c0_4 = arith.constant 0 : index
    %c0_5 = arith.constant 0 : index
    %c0_6 = arith.constant 0 : index
    %5 = vector.load %arg0[%c0_4, %c0_5, %c0_6] : memref<7x256x256xf32, #tpu.memory_space<vmem>>, vector<1x256x256xf32>
    %6 = vector.shape_cast %5 : vector<1x256x256xf32> to vector<256x256xf32>
    %cst = arith.constant dense<0.000000e+00> : vector<8x256xf32>
    %7 = tpu.matmul %4, %6, %cst {dimension_numbers = #tpu.dot_dimension_numbers<[1], [0], [0], [1], [0, 0, 1, 1], [], []>} : vector<8x256xf32>, vector<256x256xf32>, vector<8x256xf32> -> vector<8x256xf32>
    %c1_7 = arith.constant 1 : index
    %c0_8 = arith.constant 0 : index
    %c0_9 = arith.constant 0 : index
    %8 = vector.load %arg0[%c1_7, %c0_8, %c0_9] : memref<7x256x256xf32, #tpu.memory_space<vmem>>, vector<1x256x256xf32>
    %9 = vector.shape_cast %8 : vector<1x256x256xf32> to vector<256x256xf32>
    %cst_10 = arith.constant dense<0.000000e+00> : vector<8x256xf32>
    %10 = tpu.matmul %7, %9, %cst_10 {dimension_numbers = #tpu.dot_dimension_numbers<[1], [0], [0], [1], [0, 0, 1, 1], [], []>} : vector<8x256xf32>, vector<256x256xf32>, vector<8x256xf32> -> vector<8x256xf32>
    %c2 = arith.constant 2 : index
    %c0_11 = arith.constant 0 : index
    %c0_12 = arith.constant 0 : index
    %11 = vector.load %arg0[%c2, %c0_11, %c0_12] : memref<7x256x256xf32, #tpu.memory_space<vmem>>, vector<1x256x256xf32>
    %12 = vector.shape_cast %11 : vector<1x256x256xf32> to vector<256x256xf32>
    %cst_13 = arith.constant dense<0.000000e+00> : vector<8x256xf32>
    %13 = tpu.matmul %10, %12, %cst_13 {dimension_numbers = #tpu.dot_dimension_numbers<[1], [0], [0], [1], [0, 0, 1, 1], [], []>} : vector<8x256xf32>, vector<256x256xf32>, vector<8x256xf32> -> vector<8x256xf32>
    %c3 = arith.constant 3 : index
    %c0_14 = arith.constant 0 : index
    %c0_15 = arith.constant 0 : index
    %14 = vector.load %arg0[%c3, %c0_14, %c0_15] : memref<7x256x256xf32, #tpu.memory_space<vmem>>, vector<1x256x256xf32>
    %15 = vector.shape_cast %14 : vector<1x256x256xf32> to vector<256x256xf32>
    %cst_16 = arith.constant dense<0.000000e+00> : vector<8x256xf32>
    %16 = tpu.matmul %13, %15, %cst_16 {dimension_numbers = #tpu.dot_dimension_numbers<[1], [0], [0], [1], [0, 0, 1, 1], [], []>} : vector<8x256xf32>, vector<256x256xf32>, vector<8x256xf32> -> vector<8x256xf32>
    %c4 = arith.constant 4 : index
    %c0_17 = arith.constant 0 : index
    %c0_18 = arith.constant 0 : index
    %17 = vector.load %arg0[%c4, %c0_17, %c0_18] : memref<7x256x256xf32, #tpu.memory_space<vmem>>, vector<1x256x256xf32>
    %18 = vector.shape_cast %17 : vector<1x256x256xf32> to vector<256x256xf32>
    %cst_19 = arith.constant dense<0.000000e+00> : vector<8x256xf32>
    %19 = tpu.matmul %16, %18, %cst_19 {dimension_numbers = #tpu.dot_dimension_numbers<[1], [0], [0], [1], [0, 0, 1, 1], [], []>} : vector<8x256xf32>, vector<256x256xf32>, vector<8x256xf32> -> vector<8x256xf32>
    %c5 = arith.constant 5 : index
    %c0_20 = arith.constant 0 : index
    %c0_21 = arith.constant 0 : index
    %20 = vector.load %arg0[%c5, %c0_20, %c0_21] : memref<7x256x256xf32, #tpu.memory_space<vmem>>, vector<1x256x256xf32>
    %21 = vector.shape_cast %20 : vector<1x256x256xf32> to vector<256x256xf32>
    %cst_22 = arith.constant dense<0.000000e+00> : vector<8x256xf32>
    %22 = tpu.matmul %19, %21, %cst_22 {dimension_numbers = #tpu.dot_dimension_numbers<[1], [0], [0], [1], [0, 0, 1, 1], [], []>} : vector<8x256xf32>, vector<256x256xf32>, vector<8x256xf32> -> vector<8x256xf32>
    %c6 = arith.constant 6 : index
    %c0_23 = arith.constant 0 : index
    %c0_24 = arith.constant 0 : index
    %23 = vector.load %arg0[%c6, %c0_23, %c0_24] : memref<7x256x256xf32, #tpu.memory_space<vmem>>, vector<1x256x256xf32>
    %24 = vector.shape_cast %23 : vector<1x256x256xf32> to vector<256x256xf32>
    %cst_25 = arith.constant dense<0.000000e+00> : vector<8x256xf32>
    %25 = tpu.matmul %22, %24, %cst_25 {dimension_numbers = #tpu.dot_dimension_numbers<[1], [0], [0], [1], [0, 0, 1, 1], [], []>} : vector<8x256xf32>, vector<256x256xf32>, vector<8x256xf32> -> vector<8x256xf32>
    %26 = vector.extract_strided_slice %25 {offsets = [0, 0], sizes = [8, 128], strides = [1, 1]} : vector<8x256xf32> to vector<8x128xf32>
    %27 = vector.extract_strided_slice %25 {offsets = [0, 128], sizes = [8, 128], strides = [1, 1]} : vector<8x256xf32> to vector<8x128xf32>
    %c0_26 = arith.constant 0 : index
    %c0_27 = arith.constant 0 : index
    %c0_28 = arith.constant 0 : index
    %28 = vector.load %arg2[%c0_26, %c0_27, %c0_28] : memref<2x8x128xf32, #tpu.memory_space<vmem>>, vector<1x8x128xf32>
    %29 = vector.shape_cast %28 : vector<1x8x128xf32> to vector<8x128xf32>
    %30 = vector.shape_cast %26 : vector<8x128xf32> to vector<1x8x128xf32>
    tpu.vector_store %arg2[%c0_26, %c0_27, %c0_28], %30 {strides = array<i32>} : memref<2x8x128xf32, #tpu.memory_space<vmem>>, vector<1x8x128xf32>,
    %c1_29 = arith.constant 1 : index
    %c0_30 = arith.constant 0 : index
    %c0_31 = arith.constant 0 : index
    %31 = vector.load %arg2[%c1_29, %c0_30, %c0_31] : memref<2x8x128xf32, #tpu.memory_space<vmem>>, vector<1x8x128xf32>
    %32 = vector.shape_cast %31 : vector<1x8x128xf32> to vector<8x128xf32>
    %33 = vector.shape_cast %27 : vector<8x128xf32> to vector<1x8x128xf32>
    tpu.vector_store %arg2[%c1_29, %c0_30, %c0_31], %33 {strides = array<i32>} : memref<2x8x128xf32, #tpu.memory_space<vmem>>, vector<1x8x128xf32>,
    %34 = arith.mulf %26, %26 : vector<8x128xf32>
    %35 = arith.mulf %27, %27 : vector<8x128xf32>
    %36 = arith.addf %34, %35 : vector<8x128xf32>
    %c0_32 = arith.constant 0 : index
    %c0_33 = arith.constant 0 : index
    %37 = vector.load %arg3[%c0_32, %c0_33] : memref<8x128xf32, #tpu.memory_space<vmem>>, vector<8x128xf32>
    tpu.vector_store %arg3[%c0_32, %c0_33], %36 {strides = array<i32>} : memref<8x128xf32, #tpu.memory_space<vmem>>, vector<8x128xf32>,
    return
  }
}

</mosaic_0001>

<bundles_post_ra>
// kernel: tpu_custom_call.1
= control target key start
LH: loop header
LB: loop body
LE: loop exit
PB: predicated region body
PF: predicated region fallthrough
CT: control target
= control target key end

     0   :  { %9 = vsyncpa [#allocation3], 0  ;;  %s1178_s0 = inlined_call_operand.hbm [shape: f32[7,256,256], index: 0, kind: input, shape index: {}]   ;;  %s1179_s1 = inlined_call_operand.hbm [shape: f32[2,8,128], index: 1, kind: input, shape index: {}]   ;;  %s1180_s2 = inlined_call_operand.hbm [shape: f32[2,8,128], index: 2, kind: output, shape index: {0}]   ;;  %s1181_s3 = inlined_call_operand.hbm [shape: f32[8,128], index: 3, kind: output, shape index: {1}]  }
   0x1   :  { %10 = vsyncpa [#allocation6], 0 }
   0x2   :  { %11 = vsyncpa [#allocation4], 0 }
   0x3   :  { %12 = vsyncpa [#allocation9], 0  ;;  %s1132_s12 = smov [#allocation2]  }
   0x4   :  { %s18_s13 = sshll.u32 %s1132_s12, 4  ;;  %s19_s13 = int_to_ptr.vmem [resolvable:$true] %s18_s13 }
   0x5   :  { %s1052_s14 = scalar_lea.vmem %s19_s13, 57344  ;;  %p1057_p1 = scmp.lt.s32.totalorder %s19_s13, %s19_s13 }
   0x6   :  { %p1053_p0 = scmp.ne.s32.totalorder %s19_s13, %s1052_s14  ;;  %p1058_p2 = scmp.lt.s32.totalorder %s1052_s14, %s1052_s14 }
   0x8   :  { %p1059_p3 = por %p1058_p2, %p1057_p1 }
   0xa   :  { %p1060_p4 = pnand %p1059_p3, %p1053_p0 }
   0xc   :  { %1063 = shalt.err (!%p1060_p4)
}
   0xd   :  { %s1133_s15 = smov 256   ;;  %s1134_s16 = smov 16  }
   0xe   :  { %24 = dma.hbm_to_vmem [thread:$0]  %s1178_s0, 57344, %s19_s13, [#allocation3], %s1133_s15, %s1133_s15, %s1134_s16  }
   0xf   :  { %s1135_s19 = smov [#allocation5]  }
  0x10   :  { %s30_s20 = sshll.u32 %s1135_s19, 4  ;;  %s31_s20 = int_to_ptr.vmem [resolvable:$true] %s30_s20 }
  0x11   :  { %s1072_s21 = scalar_lea.vmem %s31_s20, 256  ;;  %p1077_p6 = scmp.lt.s32.totalorder %s31_s20, %s31_s20 }
  0x12   :  { %p1073_p5 = scmp.ne.s32.totalorder %s31_s20, %s1072_s21  ;;  %p1078_p7 = scmp.lt.s32.totalorder %s1072_s21, %s1072_s21 }
  0x14   :  { %p1079_p8 = por %p1078_p7, %p1077_p6 }
  0x16   :  { %p1080_p9 = pnand %p1079_p8, %p1073_p5 }
  0x18   :  { %1083 = shalt.err (!%p1080_p9)
}
  0x19   :  { %s1136_s22 = smov 128   ;;  %s1137_s23 = smov 8  }
  0x1a   :  { %36 = dma.hbm_to_vmem [thread:$0]  %s1179_s1, 256, %s31_s20, [#allocation6], %s1136_s22, %s1136_s22, %s1137_s23  }
  0x1b   :  { %1124 = dma.done.wait [#allocation3], 57344  }
  0x1c   :  { %1125 = vsyncadd [#allocation3], 4294909952 }
  0x1d   :  { %1126 = dma.done.wait [#allocation6], 256  }
  0x1e   :  { %1127 = vsyncadd [#allocation6], 4294967040  ;;  %v77_v0 = vld [vmem:[#allocation2 + $0xf8] sm:$0xff]  ;;  %v76_v1 = vld [vmem:[#allocation2 + $0xf0] sm:$0xff]  ;;  %s1138_s0 = smov [#allocation7]   ;;  %s1139_s26 = smov [#allocation8]  }
  0x1f   :  { %v75_v2 = vld [vmem:[#allocation2 + $0xe8] sm:$0xff]  ;;  %110 = vmatprep.subr.mxu0 %v77_v0  ;;  %v74_v3 = vld [vmem:[#allocation2 + $0xe0] sm:$0xff]  ;;  %v73_v4 = vld [vmem:[#allocation2 + $0xd8] sm:$0xff]  ;;  %s1009_s1 = sshll.u32 %s1138_s0, 4  ;;  %s1022_s27 = sshll.u32 %s1139_s26, 4  ;;  %s1010_s1 = int_to_ptr.vmem [resolvable:$true] %s1009_s1  ;;  %s1023_s27 = int_to_ptr.vmem [resolvable:$true] %s1022_s27 }
  0x20   :  { %111 = vmatpush1.msra.mxu0 %v76_v1  ;;  %v72_v5 = vld [vmem:[#allocation2 + $0xd0] sm:$0xff]  ;;  %v71_v6 = vld [vmem:[#allocation2 + $0xc8] sm:$0xff]  ;;  %v70_v7 = vld [vmem:[#allocation2 + $0xc0] sm:$0xff]  ;;  %s1084_s28 = scalar_lea.vmem %s1010_s1, 256  ;;  %p1089_p11 = scmp.lt.s32.totalorder %s1010_s1, %s1010_s1 }
  0x21   :  { %112 = vmatprep.subr.mxu0 %v75_v2  ;;  %v69_v8 = vld [vmem:[#allocation2 + $0xb8] sm:$0xff]  ;;  %v68_v9 = vld [vmem:[#allocation2 + $0xb0] sm:$0xff]  ;;  %v67_v10 = vld [vmem:[#allocation2 + $0xa8] sm:$0xff]  ;;  %p1085_p10 = scmp.ne.s32.totalorder %s1010_s1, %s1084_s28  ;;  %p1090_p12 = scmp.lt.s32.totalorder %s1084_s28, %s1084_s28 }
  0x22   :  { %113 = vmatpush1.msra.mxu0 %v74_v3  ;;  %v66_v11 = vld [vmem:[#allocation2 + $0xa0] sm:$0xff]  ;;  %v65_v12 = vld [vmem:[#allocation2 + $0x98] sm:$0xff]  ;;  %v64_v13 = vld [vmem:[#allocation2 + $0x90] sm:$0xff] }
  0x23   :  { %114 = vmatprep.subr.mxu0 %v73_v4  ;;  %v63_v14 = vld [vmem:[#allocation2 + $0x88] sm:$0xff]  ;;  %v62_v15 = vld [vmem:[#allocation2 + $0x80] sm:$0xff]  ;;  %v61_v16 = vld [vmem:[#allocation2 + $0x78] sm:$0xff]  ;;  %p1091_p13 = por %p1090_p12, %p1089_p11 }
  0x24   :  { %115 = vmatpush1.msra.mxu0 %v72_v5  ;;  %v60_v17 = vld [vmem:[#allocation2 + $0x70] sm:$0xff]  ;;  %v59_v18 = vld [vmem:[#allocation2 + $0x68] sm:$0xff]  ;;  %v58_v19 = vld [vmem:[#allocation2 + $0x60] sm:$0xff] }
  0x25   :  { %116 = vmatprep.subr.mxu0 %v71_v6  ;;  %v57_v20 = vld [vmem:[#allocation2 + $0x58] sm:$0xff]  ;;  %v56_v21 = vld [vmem:[#allocation2 + $0x50] sm:$0xff]  ;;  %v55_v22 = vld [vmem:[#allocation2 + $0x48] sm:$0xff]  ;;  %p1092_p0 = pnand %p1091_p13, %p1085_p10 }
  0x26   :  { %117 = vmatpush1.msra.mxu0 %v70_v7  ;;  %v54_v23 = vld [vmem:[#allocation2 + $0x40] sm:$0xff]  ;;  %v53_v24 = vld [vmem:[#allocation2 + $0x38] sm:$0xff]  ;;  %v45_v25 = vld [vmem:[#allocation5 + $0x8] sm:$0xff] }
  0x27   :  { %118 = vmatprep.subr.mxu0 %v69_v8  ;;  %174 = vmatprep.mubr.f32.mxu0 %v45_v25  ;;  %v213_v26 = vld [vmem:[#allocation2 + $0x2f8] sm:$0xff]  ;;  %v212_v27 = vld [vmem:[#allocation2 + $0x2f0] sm:$0xff]  ;;  %v211_v28 = vld [vmem:[#allocation2 + $0x2e8] sm:$0xff] }
  0x28   :  { %119 = vmatpush1.msra.mxu0 %v68_v9  ;;  %v52_v29 = vld [vmem:[#allocation2 + $0x30] sm:$0xff]  ;;  %246 = vmatprep.subr.mxu1 %v213_v26  ;;  %v210_v30 = vld [vmem:[#allocation2 + $0x2e0] sm:$0xff]  ;;  %v51_v31 = vld [vmem:[#allocation2 + $0x28] sm:$0xff] }
  0x29   :  { %120 = vmatprep.subr.mxu0 %v67_v10  ;;  %247 = vmatpush1.msra.mxu1 %v212_v27  ;;  %v209_v32 = vld [vmem:[#allocation2 + $0x2d8] sm:$0xff]  ;;  %v50_v33 = vld [vmem:[#allocation2 + $0x20] sm:$0xff]  ;;  %v208_v34 = vld [vmem:[#allocation2 + $0x2d0] sm:$0xff] }
  0x2a   :  { %121 = vmatpush1.msra.mxu0 %v66_v11  ;;  %248 = vmatprep.subr.mxu1 %v211_v28  ;;  %v49_v35 = vld [vmem:[#allocation2 + $0x18] sm:$0xff]  ;;  %v207_v36 = vld [vmem:[#allocation2 + $0x2c8] sm:$0xff]  ;;  %v48_v37 = vld [vmem:[#allocation2 + $0x10] sm:$0xff] }
  0x2b   :  { %122 = vmatprep.subr.mxu0 %v65_v12  ;;  %249 = vmatpush1.msra.mxu1 %v210_v30  ;;  %v206_v38 = vld [vmem:[#allocation2 + $0x2c0] sm:$0xff]  ;;  %v47_v39 = vld [vmem:[#allocation2 + $0x8] sm:$0xff]  ;;  %v205_v40 = vld [vmem:[#allocation2 + $0x2b8] sm:$0xff] }
  0x2c   :  { %123 = vmatpush1.msra.mxu0 %v64_v13  ;;  %250 = vmatprep.subr.mxu1 %v209_v32  ;;  %v46_v41 = vld [vmem:[#allocation2] sm:$0xff]  ;;  %v204_v42 = vld [vmem:[#allocation2 + $0x2b0] sm:$0xff]  ;;  %v109_v43 = vld [vmem:[#allocation2 + $0x1f8] sm:$0xff] }
  0x2d   :  { %124 = vmatprep.subr.mxu0 %v63_v14  ;;  %251 = vmatpush1.msra.mxu1 %v208_v34  ;;  %v203_v44 = vld [vmem:[#allocation2 + $0x2a8] sm:$0xff]  ;;  %v108_v45 = vld [vmem:[#allocation2 + $0x1f0] sm:$0xff]  ;;  %v202_v46 = vld [vmem:[#allocation2 + $0x2a0] sm:$0xff] }
  0x2e   :  { %125 = vmatpush1.msra.mxu0 %v62_v15  ;;  %252 = vmatprep.subr.mxu1 %v207_v36  ;;  %v107_v47 = vld [vmem:[#allocation2 + $0x1e8] sm:$0xff]  ;;  %v201_v48 = vld [vmem:[#allocation2 + $0x298] sm:$0xff]  ;;  %v106_v49 = vld [vmem:[#allocation2 + $0x1e0] sm:$0xff] }
  0x2f   :  { %126 = vmatprep.subr.mxu0 %v61_v16  ;;  %253 = vmatpush1.msra.mxu1 %v206_v38  ;;  %v200_v50 = vld [vmem:[#allocation2 + $0x290] sm:$0xff]  ;;  %v105_v51 = vld [vmem:[#allocation2 + $0x1d8] sm:$0xff]  ;;  %v199_v52 = vld [vmem:[#allocation2 + $0x288] sm:$0xff] }
  0x30   :  { %127 = vmatpush1.msra.mxu0 %v60_v17  ;;  %254 = vmatprep.subr.mxu1 %v205_v40  ;;  %v104_v53 = vld [vmem:[#allocation2 + $0x1d0] sm:$0xff]  ;;  %v198_v54 = vld [vmem:[#allocation2 + $0x280] sm:$0xff]  ;;  %v103_v55 = vld [vmem:[#allocation2 + $0x1c8] sm:$0xff] }
  0x31   :  { %128 = vmatprep.subr.mxu0 %v59_v18  ;;  %255 = vmatpush1.msra.mxu1 %v204_v42  ;;  %v197_v56 = vld [vmem:[#allocation2 + $0x278] sm:$0xff]  ;;  %v102_v57 = vld [vmem:[#allocation2 + $0x1c0] sm:$0xff]  ;;  %v196_v58 = vld [vmem:[#allocation2 + $0x270] sm:$0xff] }
  0x32   :  { %129 = vmatpush1.msra.mxu0 %v58_v19  ;;  %256 = vmatprep.subr.mxu1 %v203_v44  ;;  %v101_v59 = vld [vmem:[#allocation2 + $0x1b8] sm:$0xff]  ;;  %v195_v60 = vld [vmem:[#allocation2 + $0x268] sm:$0xff]  ;;  %v100_v61 = vld [vmem:[#allocation2 + $0x1b0] sm:$0xff] }
  0x33   :  { %130 = vmatprep.subr.mxu0 %v57_v20  ;;  %257 = vmatpush1.msra.mxu1 %v202_v46  ;;  %v194_v62 = vld [vmem:[#allocation2 + $0x260] sm:$0xff]  ;;  %v99_v63 = vld [vmem:[#allocation2 + $0x1a8] sm:$0xff]  ;;  %v193_v0 = vld [vmem:[#allocation2 + $0x258] sm:$0xff] }
  0x34   :  { %131 = vmatpush1.msra.mxu0 %v56_v21  ;;  %258 = vmatprep.subr.mxu1 %v201_v48  ;;  %v98_v1 = vld [vmem:[#allocation2 + $0x1a0] sm:$0xff]  ;;  %v192_v2 = vld [vmem:[#allocation2 + $0x250] sm:$0xff]  ;;  %v97_v3 = vld [vmem:[#allocation2 + $0x198] sm:$0xff] }
  0x35   :  { %132 = vmatprep.subr.mxu0 %v55_v22  ;;  %259 = vmatpush1.msra.mxu1 %v200_v50  ;;  %v191_v4 = vld [vmem:[#allocation2 + $0x248] sm:$0xff]  ;;  %v96_v5 = vld [vmem:[#allocation2 + $0x190] sm:$0xff]  ;;  %v190_v6 = vld [vmem:[#allocation2 + $0x240] sm:$0xff] }
  0x36   :  { %133 = vmatpush1.msra.mxu0 %v54_v23  ;;  %260 = vmatprep.subr.mxu1 %v199_v52  ;;  %v95_v7 = vld [vmem:[#allocation2 + $0x188] sm:$0xff]  ;;  %v189_v8 = vld [vmem:[#allocation2 + $0x238] sm:$0xff]  ;;  %v94_v9 = vld [vmem:[#allocation2 + $0x180] sm:$0xff] }
  0x37   :  { %134 = vmatprep.subr.mxu0 %v53_v24  ;;  %261 = vmatpush1.msra.mxu1 %v198_v54  ;;  %v188_v10 = vld [vmem:[#allocation2 + $0x230] sm:$0xff]  ;;  %v93_v11 = vld [vmem:[#allocation2 + $0x178] sm:$0xff]  ;;  %v187_v12 = vld [vmem:[#allocation2 + $0x228] sm:$0xff] }
  0x38   :  { %135 = vmatpush1.msra.mxu0 %v52_v29  ;;  %262 = vmatprep.subr.mxu1 %v197_v56  ;;  %v92_v13 = vld [vmem:[#allocation2 + $0x170] sm:$0xff]  ;;  %v186_v14 = vld [vmem:[#allocation2 + $0x220] sm:$0xff]  ;;  %v91_v15 = vld [vmem:[#allocation2 + $0x168] sm:$0xff] }
  0x39   :  { %136 = vmatprep.subr.mxu0 %v51_v31  ;;  %263 = vmatpush1.msra.mxu1 %v196_v58  ;;  %v185_v16 = vld [vmem:[#allocation2 + $0x218] sm:$0xff]  ;;  %v90_v17 = vld [vmem:[#allocation2 + $0x160] sm:$0xff]  ;;  %v184_v18 = vld [vmem:[#allocation2 + $0x210] sm:$0xff] }
  0x3a   :  { %137 = vmatpush1.msra.mxu0 %v50_v33  ;;  %264 = vmatprep.subr.mxu1 %v195_v60  ;;  %v89_v19 = vld [vmem:[#allocation2 + $0x158] sm:$0xff]  ;;  %v183_v20 = vld [vmem:[#allocation2 + $0x208] sm:$0xff]  ;;  %v88_v21 = vld [vmem:[#allocation2 + $0x150] sm:$0xff] }
  0x3b   :  { %138 = vmatprep.subr.mxu0 %v49_v35  ;;  %265 = vmatpush1.msra.mxu1 %v194_v62  ;;  %v182_v22 = vld [vmem:[#allocation2 + $0x200] sm:$0xff]  ;;  %v87_v23 = vld [vmem:[#allocation2 + $0x148] sm:$0xff]  ;;  %v245_v24 = vld [vmem:[#allocation2 + $0x3f8] sm:$0xff] }
  0x3c   :  { %139 = vmatpush1.msra.mxu0 %v48_v37  ;;  %266 = vmatprep.subr.mxu1 %v193_v0  ;;  %v86_v25 = vld [vmem:[#allocation2 + $0x140] sm:$0xff]  ;;  %v244_v26 = vld [vmem:[#allocation2 + $0x3f0] sm:$0xff]  ;;  %v85_v27 = vld [vmem:[#allocation2 + $0x138] sm:$0xff] }
  0x3d   :  { %140 = vmatprep.subr.mxu0 %v47_v39  ;;  %267 = vmatpush1.msra.mxu1 %v192_v2  ;;  %v243_v28 = vld [vmem:[#allocation2 + $0x3e8] sm:$0xff]  ;;  %v84_v29 = vld [vmem:[#allocation2 + $0x130] sm:$0xff]  ;;  %v242_v30 = vld [vmem:[#allocation2 + $0x3e0] sm:$0xff] }
  0x3e   :  { %141 = vmatpush1.msra.mxu0 %v46_v41  ;;  %268 = vmatprep.subr.mxu1 %v191_v4  ;;  %v83_v31 = vld [vmem:[#allocation2 + $0x128] sm:$0xff]  ;;  %v241_v32 = vld [vmem:[#allocation2 + $0x3d8] sm:$0xff]  ;;  %v82_v33 = vld [vmem:[#allocation2 + $0x120] sm:$0xff] }
  0x3f   :  { %142 = vmatprep.subr.mxu0 %v109_v43  ;;  %269 = vmatpush1.msra.mxu1 %v190_v6  ;;  %v240_v34 = vld [vmem:[#allocation2 + $0x3d0] sm:$0xff]  ;;  %v81_v35 = vld [vmem:[#allocation2 + $0x118] sm:$0xff]  ;;  %v239_v36 = vld [vmem:[#allocation2 + $0x3c8] sm:$0xff] }
  0x40   :  { %143 = vmatpush2.msra.mxu0 %v108_v45  ;;  %270 = vmatprep.subr.mxu1 %v189_v8  ;;  %v80_v37 = vld [vmem:[#allocation2 + $0x110] sm:$0xff]  ;;  %v238_v38 = vld [vmem:[#allocation2 + $0x3c0] sm:$0xff]  ;;  %v79_v39 = vld [vmem:[#allocation2 + $0x108] sm:$0xff] }
  0x41   :  { %144 = vmatprep.subr.mxu0 %v107_v47  ;;  %271 = vmatpush1.msra.mxu1 %v188_v10  ;;  %v237_v40 = vld [vmem:[#allocation2 + $0x3b8] sm:$0xff]  ;;  %v78_v41 = vld [vmem:[#allocation2 + $0x100] sm:$0xff]  ;;  %v236_v42 = vld [vmem:[#allocation2 + $0x3b0] sm:$0xff] }
  0x42   :  { %145 = vmatpush2.msra.mxu0 %v106_v49  ;;  %272 = vmatprep.subr.mxu1 %v187_v12  ;;  %v43_v43 = vld [vmem:[#allocation5] sm:$0xff]  ;;  %v235_v44 = vld [vmem:[#allocation2 + $0x3a8] sm:$0xff]  ;;  %v233_v46 = vld [vmem:[#allocation2 + $0x398] sm:$0xff] }
  0x43   :  { %146 = vmatprep.subr.mxu0 %v105_v51  ;;  %273 = vmatpush1.msra.mxu1 %v186_v14  ;;  %v234_v45 = vld [vmem:[#allocation2 + $0x3a0] sm:$0xff]  ;;  %v232_v47 = vld [vmem:[#allocation2 + $0x390] sm:$0xff]  ;;  %v231_v48 = vld [vmem:[#allocation2 + $0x388] sm:$0xff] }
  0x44   :  { %147 = vmatpush2.msra.mxu0 %v104_v53  ;;  %274 = vmatprep.subr.mxu1 %v185_v16  ;;  %v230_v49 = vld [vmem:[#allocation2 + $0x380] sm:$0xff]  ;;  %v229_v50 = vld [vmem:[#allocation2 + $0x378] sm:$0xff]  ;;  %v228_v51 = vld [vmem:[#allocation2 + $0x370] sm:$0xff] }
  0x45   :  { %148 = vmatprep.subr.mxu0 %v103_v55  ;;  %275 = vmatpush1.msra.mxu1 %v184_v18  ;;  %v227_v52 = vld [vmem:[#allocation2 + $0x368] sm:$0xff]  ;;  %v226_v53 = vld [vmem:[#allocation2 + $0x360] sm:$0xff]  ;;  %v225_v54 = vld [vmem:[#allocation2 + $0x358] sm:$0xff] }
  0x46   :  { %149 = vmatpush2.msra.mxu0 %v102_v57  ;;  %276 = vmatprep.subr.mxu1 %v183_v20  ;;  %v224_v55 = vld [vmem:[#allocation2 + $0x350] sm:$0xff]  ;;  %v223_v56 = vld [vmem:[#allocation2 + $0x348] sm:$0xff]  ;;  %v222_v57 = vld [vmem:[#allocation2 + $0x340] sm:$0xff] }
  0x47   :  { %150 = vmatprep.subr.mxu0 %v101_v59  ;;  %277 = vmatpush1.msra.mxu1 %v182_v22  ;;  %v221_v58 = vld [vmem:[#allocation2 + $0x338] sm:$0xff]  ;;  %v220_v59 = vld [vmem:[#allocation2 + $0x330] sm:$0xff]  ;;  %v219_v60 = vld [vmem:[#allocation2 + $0x328] sm:$0xff] }
  0x48   :  { %151 = vmatpush2.msra.mxu0 %v100_v61  ;;  %278 = vmatprep.subr.mxu1 %v245_v24  ;;  %v218_v61 = vld [vmem:[#allocation2 + $0x320] sm:$0xff]  ;;  %v217_v62 = vld [vmem:[#allocation2 + $0x318] sm:$0xff]  ;;  %v215_v0 = vld [vmem:[#allocation2 + $0x308] sm:$0xff] }
  0x49   :  { %152 = vmatprep.subr.mxu0 %v99_v63  ;;  %279 = vmatpush2.msra.mxu1 %v244_v26  ;;  %v216_v63 = vld [vmem:[#allocation2 + $0x310] sm:$0xff]  ;;  %v349_v2 = vld [vmem:[#allocation2 + $0x4f8] sm:$0xff]  ;;  %v347_v4 = vld [vmem:[#allocation2 + $0x4e8] sm:$0xff] }
  0x4a   :  { %153 = vmatpush2.msra.mxu0 %v98_v1  ;;  %280 = vmatprep.subr.mxu1 %v243_v28  ;;  %v214_v1 = vld [vmem:[#allocation2 + $0x300] sm:$0xff]  ;;  %v345_v6 = vld [vmem:[#allocation2 + $0x4d8] sm:$0xff]  ;;  %v343_v8 = vld [vmem:[#allocation2 + $0x4c8] sm:$0xff] }
  0x4b   :  { %154 = vmatprep.subr.mxu0 %v97_v3  ;;  %281 = vmatpush2.msra.mxu1 %v242_v30  ;;  %v348_v3 = vld [vmem:[#allocation2 + $0x4f0] sm:$0xff]  ;;  %v341_v10 = vld [vmem:[#allocation2 + $0x4b8] sm:$0xff]  ;;  %v339_v12 = vld [vmem:[#allocation2 + $0x4a8] sm:$0xff] }
  0x4c   :  { %155 = vmatpush2.msra.mxu0 %v96_v5  ;;  %282 = vmatprep.subr.mxu1 %v241_v32  ;;  %v346_v5 = vld [vmem:[#allocation2 + $0x4e0] sm:$0xff]  ;;  %v337_v14 = vld [vmem:[#allocation2 + $0x498] sm:$0xff]  ;;  %v335_v16 = vld [vmem:[#allocation2 + $0x488] sm:$0xff] }
  0x4d   :  { %156 = vmatprep.subr.mxu0 %v95_v7  ;;  %283 = vmatpush2.msra.mxu1 %v240_v34  ;;  %v344_v7 = vld [vmem:[#allocation2 + $0x4d0] sm:$0xff]  ;;  %v333_v18 = vld [vmem:[#allocation2 + $0x478] sm:$0xff]  ;;  %v331_v20 = vld [vmem:[#allocation2 + $0x468] sm:$0xff] }
  0x4e   :  { %157 = vmatpush2.msra.mxu0 %v94_v9  ;;  %284 = vmatprep.subr.mxu1 %v239_v36  ;;  %v342_v9 = vld [vmem:[#allocation2 + $0x4c0] sm:$0xff]  ;;  %v329_v22 = vld [vmem:[#allocation2 + $0x458] sm:$0xff]  ;;  %v327_v24 = vld [vmem:[#allocation2 + $0x448] sm:$0xff] }
  0x4f   :  { %158 = vmatprep.subr.mxu0 %v93_v11  ;;  %285 = vmatpush2.msra.mxu1 %v238_v38  ;;  %v340_v11 = vld [vmem:[#allocation2 + $0x4b0] sm:$0xff]  ;;  %v325_v26 = vld [vmem:[#allocation2 + $0x438] sm:$0xff]  ;;  %v323_v28 = vld [vmem:[#allocation2 + $0x428] sm:$0xff] }
  0x50   :  { %159 = vmatpush2.msra.mxu0 %v92_v13  ;;  %286 = vmatprep.subr.mxu1 %v237_v40  ;;  %v338_v13 = vld [vmem:[#allocation2 + $0x4a0] sm:$0xff]  ;;  %v321_v30 = vld [vmem:[#allocation2 + $0x418] sm:$0xff]  ;;  %v319_v32 = vld [vmem:[#allocation2 + $0x408] sm:$0xff] }
  0x51   :  { %160 = vmatprep.subr.mxu0 %v91_v15  ;;  %287 = vmatpush2.msra.mxu1 %v236_v42  ;;  %v336_v15 = vld [vmem:[#allocation2 + $0x490] sm:$0xff]  ;;  %v381_v34 = vld [vmem:[#allocation2 + $0x5f8] sm:$0xff]  ;;  %v379_v36 = vld [vmem:[#allocation2 + $0x5e8] sm:$0xff] }
  0x52   :  { %161 = vmatpush2.msra.mxu0 %v90_v17  ;;  %288 = vmatprep.subr.mxu1 %v235_v44  ;;  %v334_v17 = vld [vmem:[#allocation2 + $0x480] sm:$0xff]  ;;  %v377_v38 = vld [vmem:[#allocation2 + $0x5d8] sm:$0xff]  ;;  %v375_v40 = vld [vmem:[#allocation2 + $0x5c8] sm:$0xff] }
  0x53   :  { %162 = vmatprep.subr.mxu0 %v89_v19  ;;  %289 = vmatpush2.msra.mxu1 %v234_v45  ;;  %v332_v19 = vld [vmem:[#allocation2 + $0x470] sm:$0xff]  ;;  %v373_v42 = vld [vmem:[#allocation2 + $0x5b8] sm:$0xff]  ;;  %v371_v44 = vld [vmem:[#allocation2 + $0x5a8] sm:$0xff] }
  0x54   :  { %163 = vmatpush2.msra.mxu0 %v88_v21  ;;  %290 = vmatprep.subr.mxu1 %v233_v46  ;;  %v330_v21 = vld [vmem:[#allocation2 + $0x460] sm:$0xff]  ;;  %v369_v46 = vld [vmem:[#allocation2 + $0x598] sm:$0xff] }
  0x55   :  { %164 = vmatprep.subr.mxu0 %v87_v23  ;;  %291 = vmatpush2.msra.mxu1 %v232_v47  ;;  %v328_v23 = vld [vmem:[#allocation2 + $0x450] sm:$0xff]  ;;  %v370_v45 = vld [vmem:[#allocation2 + $0x5a0] sm:$0xff] }
  0x56   :  { %165 = vmatpush2.msra.mxu0 %v86_v25  ;;  %292 = vmatprep.subr.mxu1 %v231_v48  ;;  %v326_v25 = vld [vmem:[#allocation2 + $0x440] sm:$0xff]  ;;  %v368_v47 = vld [vmem:[#allocation2 + $0x590] sm:$0xff]  ;;  %v367_v48 = vld [vmem:[#allocation2 + $0x588] sm:$0xff] }
  0x57   :  { %166 = vmatprep.subr.mxu0 %v85_v27  ;;  %293 = vmatpush2.msra.mxu1 %v230_v49  ;;  %v324_v27 = vld [vmem:[#allocation2 + $0x430] sm:$0xff]  ;;  %v366_v49 = vld [vmem:[#allocation2 + $0x580] sm:$0xff] }
  0x58   :  { %167 = vmatpush2.msra.mxu0 %v84_v29  ;;  %294 = vmatprep.subr.mxu1 %v229_v50  ;;  %v322_v29 = vld [vmem:[#allocation2 + $0x420] sm:$0xff]  ;;  %v365_v50 = vld [vmem:[#allocation2 + $0x578] sm:$0xff] }
  0x59   :  { %168 = vmatprep.subr.mxu0 %v83_v31  ;;  %295 = vmatpush2.msra.mxu1 %v228_v51  ;;  %v320_v31 = vld [vmem:[#allocation2 + $0x410] sm:$0xff] }
  0x5a   :  { %169 = vmatpush2.msra.mxu0 %v82_v33  ;;  %296 = vmatprep.subr.mxu1 %v227_v52  ;;  %v318_v33 = vld [vmem:[#allocation2 + $0x400] sm:$0xff]  ;;  %v364_v51 = vld [vmem:[#allocation2 + $0x570] sm:$0xff]  ;;  %v363_v52 = vld [vmem:[#allocation2 + $0x568] sm:$0xff] }
  0x5b   :  { %170 = vmatprep.subr.mxu0 %v81_v35  ;;  %297 = vmatpush2.msra.mxu1 %v226_v53  ;;  %v380_v35 = vld [vmem:[#allocation2 + $0x5f0] sm:$0xff]  ;;  %v362_v53 = vld [vmem:[#allocation2 + $0x560] sm:$0xff] }
  0x5c   :  { %171 = vmatpush2.msra.mxu0 %v80_v37  ;;  %298 = vmatprep.subr.mxu1 %v225_v54  ;;  %v378_v37 = vld [vmem:[#allocation2 + $0x5e0] sm:$0xff]  ;;  %v361_v54 = vld [vmem:[#allocation2 + $0x558] sm:$0xff] }
  0x5d   :  { %172 = vmatprep.subr.mxu0 %v79_v39  ;;  %299 = vmatpush2.msra.mxu1 %v224_v55  ;;  %v376_v39 = vld [vmem:[#allocation2 + $0x5d0] sm:$0xff] }
  0x5e   :  { %173 = vmatpush2.msra.mxu0 %v78_v41  ;;  %300 = vmatprep.subr.mxu1 %v223_v56  ;;  %v374_v41 = vld [vmem:[#allocation2 + $0x5c0] sm:$0xff]  ;;  %v360_v55 = vld [vmem:[#allocation2 + $0x550] sm:$0xff]  ;;  %v359_v56 = vld [vmem:[#allocation2 + $0x548] sm:$0xff] }
  0x5f   :  { %175 = vmatmul.mubr.f32.vlgmr.msra.gmra.mxu0 %v43_v43  ;;  %301 = vmatpush2.msra.mxu1 %v222_v57  ;;  %v372_v43 = vld [vmem:[#allocation2 + $0x5b0] sm:$0xff]  ;;  %v358_v57 = vld [vmem:[#allocation2 + $0x540] sm:$0xff] }
  0x60   :  { %302 = vmatprep.subr.mxu1 %v221_v58  ;;  %382 = vmatprep.subr.mxu0 %v349_v2  ;;  %v357_v58 = vld [vmem:[#allocation2 + $0x538] sm:$0xff]  ;;  %v351_v2 = vld [vmem:[#allocation2 + $0x508] sm:$0xff] }
  0x61   :  { %303 = vmatpush2.msra.mxu1 %v220_v59  ;;  %383 = vmatpush1.msra.mxu0 %v348_v3  ;;  %v356_v59 = vld [vmem:[#allocation2 + $0x530] sm:$0xff]  ;;  %v350_v3 = vld [vmem:[#allocation2 + $0x500] sm:$0xff] }
  0x62   :  { %304 = vmatprep.subr.mxu1 %v219_v60  ;;  %384 = vmatprep.subr.mxu0 %v347_v4  ;;  %v355_v60 = vld [vmem:[#allocation2 + $0x528] sm:$0xff]  ;;  %v485_v4 = vld [vmem:[#allocation2 + $0x6f8] sm:$0xff] }
  0x63   :  { %305 = vmatpush2.msra.mxu1 %v218_v61  ;;  %385 = vmatpush1.msra.mxu0 %v346_v5  ;;  %v354_v61 = vld [vmem:[#allocation2 + $0x520] sm:$0xff]  ;;  %v484_v5 = vld [vmem:[#allocation2 + $0x6f0] sm:$0xff] }
  0x64   :  { %306 = vmatprep.subr.mxu1 %v217_v62  ;;  %386 = vmatprep.subr.mxu0 %v345_v6  ;;  %v483_v6 = vld [vmem:[#allocation2 + $0x6e8] sm:$0xff] }
  0x65   :  { %307 = vmatpush2.msra.mxu1 %v216_v63  ;;  %387 = vmatpush1.msra.mxu0 %v344_v7  ;;  %v482_v7 = vld [vmem:[#allocation2 + $0x6e0] sm:$0xff] }
  0x66   :  { %308 = vmatprep.subr.mxu1 %v215_v0  ;;  %388 = vmatprep.subr.mxu0 %v343_v8  ;;  %v353_v0 = vld [vmem:[#allocation2 + $0x518] sm:$0xff] }
  0x67   :  { %309 = vmatpush2.msra.mxu1 %v214_v1  ;;  %389 = vmatpush1.msra.mxu0 %v342_v9  ;;  %v352_v1 = vld [vmem:[#allocation2 + $0x510] sm:$0xff]  ;;  %v481_v8 = vld [vmem:[#allocation2 + $0x6d8] sm:$0xff] }
  0x68   :  { %390 = vmatprep.subr.mxu0 %v341_v10  ;;  %518 = vmatprep.subr.mxu1 %v485_v4  ;;  %v480_v9 = vld [vmem:[#allocation2 + $0x6d0] sm:$0xff]  ;;  %v479_v10 = vld [vmem:[#allocation2 + $0x6c8] sm:$0xff] }
  0x69   :  { %391 = vmatpush1.msra.mxu0 %v340_v11  ;;  %v478_v11 = vld [vmem:[#allocation2 + $0x6c0] sm:$0xff]  ;;  %v487_v4 = vld [vmem:[#allocation2 + $0x708] sm:$0xff] }
  0x6a   :  { %392 = vmatprep.subr.mxu0 %v339_v12  ;;  %v477_v12 = vld [vmem:[#allocation2 + $0x6b8] sm:$0xff] }
  0x6b   :  { %393 = vmatpush1.msra.mxu0 %v338_v13  ;;  %v476_v13 = vld [vmem:[#allocation2 + $0x6b0] sm:$0xff] }
  0x6c   :  { %394 = vmatprep.subr.mxu0 %v337_v14  ;;  %v475_v14 = vld [vmem:[#allocation2 + $0x6a8] sm:$0xff] }
  0x6d   :  { %395 = vmatpush1.msra.mxu0 %v336_v15  ;;  %v474_v15 = vld [vmem:[#allocation2 + $0x6a0] sm:$0xff] }
  0x6e   :  { %396 = vmatprep.subr.mxu0 %v335_v16  ;;  %v473_v16 = vld [vmem:[#allocation2 + $0x698] sm:$0xff] }
  0x6f   :  { %397 = vmatpush1.msra.mxu0 %v334_v17  ;;  %v472_v17 = vld [vmem:[#allocation2 + $0x690] sm:$0xff] }
  0x70   :  { %398 = vmatprep.subr.mxu0 %v333_v18  ;;  %v471_v18 = vld [vmem:[#allocation2 + $0x688] sm:$0xff] }
  0x71   :  { %399 = vmatpush1.msra.mxu0 %v332_v19  ;;  %v470_v19 = vld [vmem:[#allocation2 + $0x680] sm:$0xff] }
  0x72   :  { %400 = vmatprep.subr.mxu0 %v331_v20  ;;  %v469_v20 = vld [vmem:[#allocation2 + $0x678] sm:$0xff] }
  0x73   :  { %401 = vmatpush1.msra.mxu0 %v330_v21  ;;  %v468_v21 = vld [vmem:[#allocation2 + $0x670] sm:$0xff] }
  0x74   :  { %402 = vmatprep.subr.mxu0 %v329_v22  ;;  %v467_v22 = vld [vmem:[#allocation2 + $0x668] sm:$0xff] }
  0x75   :  { %403 = vmatpush1.msra.mxu0 %v328_v23  ;;  %v466_v23 = vld [vmem:[#allocation2 + $0x660] sm:$0xff] }
  0x76   :  { %404 = vmatprep.subr.mxu0 %v327_v24  ;;  %v465_v24 = vld [vmem:[#allocation2 + $0x658] sm:$0xff] }
  0x77   :  { %405 = vmatpush1.msra.mxu0 %v326_v25  ;;  %v464_v25 = vld [vmem:[#allocation2 + $0x650] sm:$0xff] }
  0x78   :  { %406 = vmatprep.subr.mxu0 %v325_v26  ;;  %v463_v26 = vld [vmem:[#allocation2 + $0x648] sm:$0xff] }
  0x79   :  { %407 = vmatpush1.msra.mxu0 %v324_v27  ;;  %v462_v27 = vld [vmem:[#allocation2 + $0x640] sm:$0xff] }
  0x7a   :  { %408 = vmatprep.subr.mxu0 %v323_v28  ;;  %v461_v28 = vld [vmem:[#allocation2 + $0x638] sm:$0xff] }
  0x7b   :  { %409 = vmatpush1.msra.mxu0 %v322_v29  ;;  %v460_v29 = vld [vmem:[#allocation2 + $0x630] sm:$0xff] }
  0x7c   :  { %410 = vmatprep.subr.mxu0 %v321_v30  ;;  %v459_v30 = vld [vmem:[#allocation2 + $0x628] sm:$0xff] }
  0x7d   :  { %411 = vmatpush1.msra.mxu0 %v320_v31  ;;  %v458_v31 = vld [vmem:[#allocation2 + $0x620] sm:$0xff] }
  0x7e   :  { %412 = vmatprep.subr.mxu0 %v319_v32  ;;  %v457_v32 = vld [vmem:[#allocation2 + $0x618] sm:$0xff] }
  0x7f   :  { %413 = vmatpush1.msra.mxu0 %v318_v33  ;;  %v456_v33 = vld [vmem:[#allocation2 + $0x610] sm:$0xff] }
  0x80   :  { %414 = vmatprep.subr.mxu0 %v381_v34  ;;  %v455_v34 = vld [vmem:[#allocation2 + $0x608] sm:$0xff] }
  0x81   :  { %415 = vmatpush2.msra.mxu0 %v380_v35  ;;  %v454_v35 = vld [vmem:[#allocation2 + $0x600] sm:$0xff] }
  0x82   :  { %416 = vmatprep.subr.mxu0 %v379_v36  ;;  %v517_v36 = vld [vmem:[#allocation2 + $0x7f8] sm:$0xff] }
  0x83   :  { %417 = vmatpush2.msra.mxu0 %v378_v37  ;;  %v516_v37 = vld [vmem:[#allocation2 + $0x7f0] sm:$0xff] }
  0x84   :  { %418 = vmatprep.subr.mxu0 %v377_v38  ;;  %v515_v38 = vld [vmem:[#allocation2 + $0x7e8] sm:$0xff] }
  0x85   :  { %419 = vmatpush2.msra.mxu0 %v376_v39  ;;  %v514_v39 = vld [vmem:[#allocation2 + $0x7e0] sm:$0xff] }
  0x86   :  { %420 = vmatprep.subr.mxu0 %v375_v40  ;;  %v513_v40 = vld [vmem:[#allocation2 + $0x7d8] sm:$0xff] }
  0x87   :  { %421 = vmatpush2.msra.mxu0 %v374_v41  ;;  %v512_v41 = vld [vmem:[#allocation2 + $0x7d0] sm:$0xff] }
  0x88   :  { %422 = vmatprep.subr.mxu0 %v373_v42  ;;  %v511_v42 = vld [vmem:[#allocation2 + $0x7c8] sm:$0xff] }
  0x89   :  { %423 = vmatpush2.msra.mxu0 %v372_v43  ;;  %v510_v43 = vld [vmem:[#allocation2 + $0x7c0] sm:$0xff] }
  0x8a   :  { %424 = vmatprep.subr.mxu0 %v371_v44  ;;  %v509_v44 = vld [vmem:[#allocation2 + $0x7b8] sm:$0xff] }
  0x8b   :  { %425 = vmatpush2.msra.mxu0 %v370_v45  ;;  %v508_v45 = vld [vmem:[#allocation2 + $0x7b0] sm:$0xff] }
  0x8c   :  { %426 = vmatprep.subr.mxu0 %v369_v46  ;;  %v507_v46 = vld [vmem:[#allocation2 + $0x7a8] sm:$0xff] }
  0x8d   :  { %427 = vmatpush2.msra.mxu0 %v368_v47  ;;  %v506_v47 = vld [vmem:[#allocation2 + $0x7a0] sm:$0xff] }
  0x8e   :  { %428 = vmatprep.subr.mxu0 %v367_v48  ;;  %v505_v48 = vld [vmem:[#allocation2 + $0x798] sm:$0xff] }
  0x8f   :  { %429 = vmatpush2.msra.mxu0 %v366_v49  ;;  %v504_v49 = vld [vmem:[#allocation2 + $0x790] sm:$0xff] }
  0x90   :  { %430 = vmatprep.subr.mxu0 %v365_v50  ;;  %v503_v50 = vld [vmem:[#allocation2 + $0x788] sm:$0xff] }
  0x91   :  { %431 = vmatpush2.msra.mxu0 %v364_v51  ;;  %v502_v51 = vld [vmem:[#allocation2 + $0x780] sm:$0xff] }
  0x92   :  { %432 = vmatprep.subr.mxu0 %v363_v52  ;;  %v501_v52 = vld [vmem:[#allocation2 + $0x778] sm:$0xff] }
  0x93   :  { %433 = vmatpush2.msra.mxu0 %v362_v53  ;;  %v500_v53 = vld [vmem:[#allocation2 + $0x770] sm:$0xff] }
  0x94   :  { %434 = vmatprep.subr.mxu0 %v361_v54  ;;  %v499_v54 = vld [vmem:[#allocation2 + $0x768] sm:$0xff] }
  0x95   :  { %435 = vmatpush2.msra.mxu0 %v360_v55  ;;  %v498_v55 = vld [vmem:[#allocation2 + $0x760] sm:$0xff] }
  0x96   :  { %436 = vmatprep.subr.mxu0 %v359_v56  ;;  %v497_v56 = vld [vmem:[#allocation2 + $0x758] sm:$0xff] }
  0x97   :  { %437 = vmatpush2.msra.mxu0 %v358_v57  ;;  %v496_v57 = vld [vmem:[#allocation2 + $0x750] sm:$0xff] }
  0x98   :  { %438 = vmatprep.subr.mxu0 %v357_v58  ;;  %v495_v58 = vld [vmem:[#allocation2 + $0x748] sm:$0xff] }
  0x99   :  { %439 = vmatpush2.msra.mxu0 %v356_v59  ;;  %v494_v59 = vld [vmem:[#allocation2 + $0x740] sm:$0xff] }
  0x9a   :  { %440 = vmatprep.subr.mxu0 %v355_v60  ;;  %v493_v60 = vld [vmem:[#allocation2 + $0x738] sm:$0xff] }
  0x9b   :  { %441 = vmatpush2.msra.mxu0 %v354_v61  ;;  %v492_v61 = vld [vmem:[#allocation2 + $0x730] sm:$0xff] }
  0x9c   :  { %442 = vmatprep.subr.mxu0 %v353_v0 }
  0x9d   :  { %443 = vmatpush2.msra.mxu0 %v352_v1 }
  0x9e   :  { %444 = vmatprep.subr.mxu0 %v351_v2  ;;  %v489_v2 = vld [vmem:[#allocation2 + $0x718] sm:$0xff] }
  0x9f   :  { %445 = vmatpush2.msra.mxu0 %v350_v3  ;;  %v488_v3 = vld [vmem:[#allocation2 + $0x710] sm:$0xff] }
 0x11f   :  { %v176_v62 = vpop.f32.mrf.mxu0 }
 0x121   :  { %v178_v63 = vpop.f32.mrf.mxu0 }
 0x122   :  { %310 = vmatprep.mubr.f32.mxu1 %v178_v63  ;;  %v490_v63 = vld [vmem:[#allocation2 + $0x720] sm:$0xff] }
 0x123   :  { %311 = vmatmul.mubr.f32.vlgmr.msra.gmra.mxu1 %v176_v62  ;;  %v491_v62 = vld [vmem:[#allocation2 + $0x728] sm:$0xff] }
 0x124   :  { %519 = vmatpush1.msra.mxu1 %v484_v5  ;;  %v486_v5 = vld [vmem:[#allocation2 + $0x700] sm:$0xff] }
 0x125   :  { %520 = vmatprep.subr.mxu1 %v483_v6  ;;  %v621_v6 = vld [vmem:[#allocation2 + $0x8f8] sm:$0xff] }
 0x126   :  { %521 = vmatpush1.msra.mxu1 %v482_v7  ;;  %v620_v7 = vld [vmem:[#allocation2 + $0x8f0] sm:$0xff]  ;;  %654 = vmatprep.subr.mxu0 %v621_v6  ;;  %v623_v6 = vld [vmem:[#allocation2 + $0x908] sm:$0xff] }
 0x127   :  { %522 = vmatprep.subr.mxu1 %v481_v8  ;;  %v619_v8 = vld [vmem:[#allocation2 + $0x8e8] sm:$0xff] }
 0x128   :  { %523 = vmatpush1.msra.mxu1 %v480_v9  ;;  %v618_v9 = vld [vmem:[#allocation2 + $0x8e0] sm:$0xff] }
 0x129   :  { %524 = vmatprep.subr.mxu1 %v479_v10  ;;  %v617_v10 = vld [vmem:[#allocation2 + $0x8d8] sm:$0xff] }
 0x12a   :  { %525 = vmatpush1.msra.mxu1 %v478_v11  ;;  %v616_v11 = vld [vmem:[#allocation2 + $0x8d0] sm:$0xff] }
 0x12b   :  { %526 = vmatprep.subr.mxu1 %v477_v12  ;;  %v615_v12 = vld [vmem:[#allocation2 + $0x8c8] sm:$0xff] }
 0x12c   :  { %527 = vmatpush1.msra.mxu1 %v476_v13  ;;  %v614_v13 = vld [vmem:[#allocation2 + $0x8c0] sm:$0xff] }
 0x12d   :  { %528 = vmatprep.subr.mxu1 %v475_v14  ;;  %v613_v14 = vld [vmem:[#allocation2 + $0x8b8] sm:$0xff] }
 0x12e   :  { %529 = vmatpush1.msra.mxu1 %v474_v15  ;;  %v612_v15 = vld [vmem:[#allocation2 + $0x8b0] sm:$0xff] }
 0x12f   :  { %530 = vmatprep.subr.mxu1 %v473_v16  ;;  %v611_v16 = vld [vmem:[#allocation2 + $0x8a8] sm:$0xff] }
 0x130   :  { %531 = vmatpush1.msra.mxu1 %v472_v17  ;;  %v610_v17 = vld [vmem:[#allocation2 + $0x8a0] sm:$0xff] }
 0x131   :  { %532 = vmatprep.subr.mxu1 %v471_v18  ;;  %v609_v18 = vld [vmem:[#allocation2 + $0x898] sm:$0xff] }
 0x132   :  { %533 = vmatpush1.msra.mxu1 %v470_v19  ;;  %v608_v19 = vld [vmem:[#allocation2 + $0x890] sm:$0xff] }
 0x133   :  { %534 = vmatprep.subr.mxu1 %v469_v20  ;;  %v607_v20 = vld [vmem:[#allocation2 + $0x888] sm:$0xff] }
 0x134   :  { %535 = vmatpush1.msra.mxu1 %v468_v21  ;;  %v606_v21 = vld [vmem:[#allocation2 + $0x880] sm:$0xff] }
 0x135   :  { %536 = vmatprep.subr.mxu1 %v467_v22  ;;  %v605_v22 = vld [vmem:[#allocation2 + $0x878] sm:$0xff] }
 0x136   :  { %537 = vmatpush1.msra.mxu1 %v466_v23  ;;  %v604_v23 = vld [vmem:[#allocation2 + $0x870] sm:$0xff] }
 0x137   :  { %538 = vmatprep.subr.mxu1 %v465_v24  ;;  %v603_v24 = vld [vmem:[#allocation2 + $0x868] sm:$0xff] }
 0x138   :  { %539 = vmatpush1.msra.mxu1 %v464_v25  ;;  %v602_v25 = vld [vmem:[#allocation2 + $0x860] sm:$0xff] }
 0x139   :  { %540 = vmatprep.subr.mxu1 %v463_v26  ;;  %v601_v26 = vld [vmem:[#allocation2 + $0x858] sm:$0xff] }
 0x13a   :  { %541 = vmatpush1.msra.mxu1 %v462_v27  ;;  %v600_v27 = vld [vmem:[#allocation2 + $0x850] sm:$0xff] }
 0x13b   :  { %542 = vmatprep.subr.mxu1 %v461_v28  ;;  %v599_v28 = vld [vmem:[#allocation2 + $0x848] sm:$0xff] }
 0x13c   :  { %543 = vmatpush1.msra.mxu1 %v460_v29  ;;  %v598_v29 = vld [vmem:[#allocation2 + $0x840] sm:$0xff] }
 0x13d   :  { %544 = vmatprep.subr.mxu1 %v459_v30  ;;  %v597_v30 = vld [vmem:[#allocation2 + $0x838] sm:$0xff] }
 0x13e   :  { %545 = vmatpush1.msra.mxu1 %v458_v31  ;;  %v596_v31 = vld [vmem:[#allocation2 + $0x830] sm:$0xff] }
 0x13f   :  { %546 = vmatprep.subr.mxu1 %v457_v32  ;;  %v595_v32 = vld [vmem:[#allocation2 + $0x828] sm:$0xff] }
 0x140   :  { %547 = vmatpush1.msra.mxu1 %v456_v33  ;;  %v594_v33 = vld [vmem:[#allocation2 + $0x820] sm:$0xff] }
 0x141   :  { %548 = vmatprep.subr.mxu1 %v455_v34  ;;  %v593_v34 = vld [vmem:[#allocation2 + $0x818] sm:$0xff] }
 0x142   :  { %549 = vmatpush1.msra.mxu1 %v454_v35  ;;  %v592_v35 = vld [vmem:[#allocation2 + $0x810] sm:$0xff] }
 0x143   :  { %550 = vmatprep.subr.mxu1 %v517_v36  ;;  %v591_v36 = vld [vmem:[#allocation2 + $0x808] sm:$0xff] }
 0x144   :  { %551 = vmatpush2.msra.mxu1 %v516_v37  ;;  %v590_v37 = vld [vmem:[#allocation2 + $0x800] sm:$0xff] }
 0x145   :  { %552 = vmatprep.subr.mxu1 %v515_v38  ;;  %v653_v38 = vld [vmem:[#allocation2 + $0x9f8] sm:$0xff] }
 0x146   :  { %553 = vmatpush2.msra.mxu1 %v514_v39  ;;  %v652_v39 = vld [vmem:[#allocation2 + $0x9f0] sm:$0xff] }
 0x147   :  { %554 = vmatprep.subr.mxu1 %v513_v40  ;;  %v651_v40 = vld [vmem:[#allocation2 + $0x9e8] sm:$0xff] }
 0x148   :  { %555 = vmatpush2.msra.mxu1 %v512_v41  ;;  %v650_v41 = vld [vmem:[#allocation2 + $0x9e0] sm:$0xff] }
 0x149   :  { %556 = vmatprep.subr.mxu1 %v511_v42  ;;  %v649_v42 = vld [vmem:[#allocation2 + $0x9d8] sm:$0xff] }
 0x14a   :  { %557 = vmatpush2.msra.mxu1 %v510_v43  ;;  %v648_v43 = vld [vmem:[#allocation2 + $0x9d0] sm:$0xff] }
 0x14b   :  { %558 = vmatprep.subr.mxu1 %v509_v44  ;;  %v647_v44 = vld [vmem:[#allocation2 + $0x9c8] sm:$0xff] }
 0x14c   :  { %559 = vmatpush2.msra.mxu1 %v508_v45  ;;  %v646_v45 = vld [vmem:[#allocation2 + $0x9c0] sm:$0xff] }
 0x14d   :  { %560 = vmatprep.subr.mxu1 %v507_v46  ;;  %v645_v46 = vld [vmem:[#allocation2 + $0x9b8] sm:$0xff] }
 0x14e   :  { %561 = vmatpush2.msra.mxu1 %v506_v47  ;;  %v644_v47 = vld [vmem:[#allocation2 + $0x9b0] sm:$0xff] }
 0x14f   :  { %562 = vmatprep.subr.mxu1 %v505_v48  ;;  %v643_v48 = vld [vmem:[#allocation2 + $0x9a8] sm:$0xff] }
 0x150   :  { %563 = vmatpush2.msra.mxu1 %v504_v49  ;;  %v642_v49 = vld [vmem:[#allocation2 + $0x9a0] sm:$0xff] }
 0x151   :  { %564 = vmatprep.subr.mxu1 %v503_v50  ;;  %v641_v50 = vld [vmem:[#allocation2 + $0x998] sm:$0xff] }
 0x152   :  { %565 = vmatpush2.msra.mxu1 %v502_v51  ;;  %v640_v51 = vld [vmem:[#allocation2 + $0x990] sm:$0xff] }
 0x153   :  { %566 = vmatprep.subr.mxu1 %v501_v52  ;;  %v639_v52 = vld [vmem:[#allocation2 + $0x988] sm:$0xff] }
 0x154   :  { %567 = vmatpush2.msra.mxu1 %v500_v53  ;;  %v638_v53 = vld [vmem:[#allocation2 + $0x980] sm:$0xff] }
 0x155   :  { %568 = vmatprep.subr.mxu1 %v499_v54  ;;  %v637_v54 = vld [vmem:[#allocation2 + $0x978] sm:$0xff] }
 0x156   :  { %569 = vmatpush2.msra.mxu1 %v498_v55  ;;  %v636_v55 = vld [vmem:[#allocation2 + $0x970] sm:$0xff] }
 0x157   :  { %570 = vmatprep.subr.mxu1 %v497_v56  ;;  %v635_v56 = vld [vmem:[#allocation2 + $0x968] sm:$0xff] }
 0x158   :  { %571 = vmatpush2.msra.mxu1 %v496_v57  ;;  %v634_v57 = vld [vmem:[#allocation2 + $0x960] sm:$0xff] }
 0x159   :  { %572 = vmatprep.subr.mxu1 %v495_v58  ;;  %v633_v58 = vld [vmem:[#allocation2 + $0x958] sm:$0xff] }
 0x15a   :  { %573 = vmatpush2.msra.mxu1 %v494_v59  ;;  %v632_v59 = vld [vmem:[#allocation2 + $0x950] sm:$0xff] }
 0x15b   :  { %574 = vmatprep.subr.mxu1 %v493_v60  ;;  %v631_v60 = vld [vmem:[#allocation2 + $0x948] sm:$0xff] }
 0x15c   :  { %575 = vmatpush2.msra.mxu1 %v492_v61  ;;  %v630_v61 = vld [vmem:[#allocation2 + $0x940] sm:$0xff] }
 0x15d   :  { %576 = vmatprep.subr.mxu1 %v491_v62  ;;  %v629_v62 = vld [vmem:[#allocation2 + $0x938] sm:$0xff] }
 0x15e   :  { %577 = vmatpush2.msra.mxu1 %v490_v63  ;;  %v628_v63 = vld [vmem:[#allocation2 + $0x930] sm:$0xff] }
 0x15f   :  { %578 = vmatprep.subr.mxu1 %v489_v2 }
 0x160   :  { %579 = vmatpush2.msra.mxu1 %v488_v3 }
 0x161   :  { %580 = vmatprep.subr.mxu1 %v487_v4  ;;  %v625_v4 = vld [vmem:[#allocation2 + $0x918] sm:$0xff] }
 0x162   :  { %581 = vmatpush2.msra.mxu1 %v486_v5  ;;  %v624_v5 = vld [vmem:[#allocation2 + $0x910] sm:$0xff] }
 0x1e3   :  { %v312_v0 = vpop.f32.mrf.mxu1 }
 0x1e5   :  { %v314_v1 = vpop.f32.mrf.mxu1 }
 0x1e6   :  { %446 = vmatprep.mubr.f32.mxu0 %v314_v1  ;;  %v626_v1 = vld [vmem:[#allocation2 + $0x920] sm:$0xff] }
 0x1e7   :  { %447 = vmatmul.mubr.f32.vlgmr.msra.gmra.mxu0 %v312_v0  ;;  %v627_v0 = vld [vmem:[#allocation2 + $0x928] sm:$0xff] }
 0x1e8   :  { %655 = vmatpush1.msra.mxu0 %v620_v7  ;;  %v622_v7 = vld [vmem:[#allocation2 + $0x900] sm:$0xff] }
 0x1e9   :  { %656 = vmatprep.subr.mxu0 %v619_v8  ;;  %v757_v8 = vld [vmem:[#allocation2 + $0xaf8] sm:$0xff] }
 0x1ea   :  { %657 = vmatpush1.msra.mxu0 %v618_v9  ;;  %v756_v9 = vld [vmem:[#allocation2 + $0xaf0] sm:$0xff]  ;;  %790 = vmatprep.subr.mxu1 %v757_v8  ;;  %v759_v8 = vld [vmem:[#allocation2 + $0xb08] sm:$0xff] }
 0x1eb   :  { %658 = vmatprep.subr.mxu0 %v617_v10  ;;  %v755_v10 = vld [vmem:[#allocation2 + $0xae8] sm:$0xff] }
 0x1ec   :  { %659 = vmatpush1.msra.mxu0 %v616_v11  ;;  %v754_v11 = vld [vmem:[#allocation2 + $0xae0] sm:$0xff] }
 0x1ed   :  { %660 = vmatprep.subr.mxu0 %v615_v12  ;;  %v753_v12 = vld [vmem:[#allocation2 + $0xad8] sm:$0xff] }
 0x1ee   :  { %661 = vmatpush1.msra.mxu0 %v614_v13  ;;  %v752_v13 = vld [vmem:[#allocation2 + $0xad0] sm:$0xff] }
 0x1ef   :  { %662 = vmatprep.subr.mxu0 %v613_v14  ;;  %v751_v14 = vld [vmem:[#allocation2 + $0xac8] sm:$0xff] }
 0x1f0   :  { %663 = vmatpush1.msra.mxu0 %v612_v15  ;;  %v750_v15 = vld [vmem:[#allocation2 + $0xac0] sm:$0xff] }
 0x1f1   :  { %664 = vmatprep.subr.mxu0 %v611_v16  ;;  %v749_v16 = vld [vmem:[#allocation2 + $0xab8] sm:$0xff] }
 0x1f2   :  { %665 = vmatpush1.msra.mxu0 %v610_v17  ;;  %v748_v17 = vld [vmem:[#allocation2 + $0xab0] sm:$0xff] }
 0x1f3   :  { %666 = vmatprep.subr.mxu0 %v609_v18  ;;  %v747_v18 = vld [vmem:[#allocation2 + $0xaa8] sm:$0xff] }
 0x1f4   :  { %667 = vmatpush1.msra.mxu0 %v608_v19  ;;  %v746_v19 = vld [vmem:[#allocation2 + $0xaa0] sm:$0xff] }
 0x1f5   :  { %668 = vmatprep.subr.mxu0 %v607_v20  ;;  %v745_v20 = vld [vmem:[#allocation2 + $0xa98] sm:$0xff] }
 0x1f6   :  { %669 = vmatpush1.msra.mxu0 %v606_v21  ;;  %v744_v21 = vld [vmem:[#allocation2 + $0xa90] sm:$0xff] }
 0x1f7   :  { %670 = vmatprep.subr.mxu0 %v605_v22  ;;  %v743_v22 = vld [vmem:[#allocation2 + $0xa88] sm:$0xff] }
 0x1f8   :  { %671 = vmatpush1.msra.mxu0 %v604_v23  ;;  %v742_v23 = vld [vmem:[#allocation2 + $0xa80] sm:$0xff] }
 0x1f9   :  { %672 = vmatprep.subr.mxu0 %v603_v24  ;;  %v741_v24 = vld [vmem:[#allocation2 + $0xa78] sm:$0xff] }
 0x1fa   :  { %673 = vmatpush1.msra.mxu0 %v602_v25  ;;  %v740_v25 = vld [vmem:[#allocation2 + $0xa70] sm:$0xff] }
 0x1fb   :  { %674 = vmatprep.subr.mxu0 %v601_v26  ;;  %v739_v26 = vld [vmem:[#allocation2 + $0xa68] sm:$0xff] }
 0x1fc   :  { %675 = vmatpush1.msra.mxu0 %v600_v27  ;;  %v738_v27 = vld [vmem:[#allocation2 + $0xa60] sm:$0xff] }
 0x1fd   :  { %676 = vmatprep.subr.mxu0 %v599_v28  ;;  %v737_v28 = vld [vmem:[#allocation2 + $0xa58] sm:$0xff] }
 0x1fe   :  { %677 = vmatpush1.msra.mxu0 %v598_v29  ;;  %v736_v29 = vld [vmem:[#allocation2 + $0xa50] sm:$0xff] }
 0x1ff   :  { %678 = vmatprep.subr.mxu0 %v597_v30  ;;  %v735_v30 = vld [vmem:[#allocation2 + $0xa48] sm:$0xff] }
 0x200   :  { %679 = vmatpush1.msra.mxu0 %v596_v31  ;;  %v734_v31 = vld [vmem:[#allocation2 + $0xa40] sm:$0xff] }
 0x201   :  { %680 = vmatprep.subr.mxu0 %v595_v32  ;;  %v733_v32 = vld [vmem:[#allocation2 + $0xa38] sm:$0xff] }
 0x202   :  { %681 = vmatpush1.msra.mxu0 %v594_v33  ;;  %v732_v33 = vld [vmem:[#allocation2 + $0xa30] sm:$0xff] }
 0x203   :  { %682 = vmatprep.subr.mxu0 %v593_v34  ;;  %v731_v34 = vld [vmem:[#allocation2 + $0xa28] sm:$0xff] }
 0x204   :  { %683 = vmatpush1.msra.mxu0 %v592_v35  ;;  %v730_v35 = vld [vmem:[#allocation2 + $0xa20] sm:$0xff] }
 0x205   :  { %684 = vmatprep.subr.mxu0 %v591_v36  ;;  %v729_v36 = vld [vmem:[#allocation2 + $0xa18] sm:$0xff] }
 0x206   :  { %685 = vmatpush1.msra.mxu0 %v590_v37  ;;  %v728_v37 = vld [vmem:[#allocation2 + $0xa10] sm:$0xff] }
 0x207   :  { %686 = vmatprep.subr.mxu0 %v653_v38  ;;  %v727_v38 = vld [vmem:[#allocation2 + $0xa08] sm:$0xff] }
 0x208   :  { %687 = vmatpush2.msra.mxu0 %v652_v39  ;;  %v726_v39 = vld [vmem:[#allocation2 + $0xa00] sm:$0xff] }
 0x209   :  { %688 = vmatprep.subr.mxu0 %v651_v40  ;;  %v789_v40 = vld [vmem:[#allocation2 + $0xbf8] sm:$0xff] }
 0x20a   :  { %689 = vmatpush2.msra.mxu0 %v650_v41  ;;  %v788_v41 = vld [vmem:[#allocation2 + $0xbf0] sm:$0xff] }
 0x20b   :  { %690 = vmatprep.subr.mxu0 %v649_v42  ;;  %v787_v42 = vld [vmem:[#allocation2 + $0xbe8] sm:$0xff] }
 0x20c   :  { %691 = vmatpush2.msra.mxu0 %v648_v43  ;;  %v786_v43 = vld [vmem:[#allocation2 + $0xbe0] sm:$0xff] }
 0x20d   :  { %692 = vmatprep.subr.mxu0 %v647_v44  ;;  %v785_v44 = vld [vmem:[#allocation2 + $0xbd8] sm:$0xff] }
 0x20e   :  { %693 = vmatpush2.msra.mxu0 %v646_v45  ;;  %v784_v45 = vld [vmem:[#allocation2 + $0xbd0] sm:$0xff] }
 0x20f   :  { %694 = vmatprep.subr.mxu0 %v645_v46  ;;  %v783_v46 = vld [vmem:[#allocation2 + $0xbc8] sm:$0xff] }
 0x210   :  { %695 = vmatpush2.msra.mxu0 %v644_v47  ;;  %v782_v47 = vld [vmem:[#allocation2 + $0xbc0] sm:$0xff] }
 0x211   :  { %696 = vmatprep.subr.mxu0 %v643_v48  ;;  %v781_v48 = vld [vmem:[#allocation2 + $0xbb8] sm:$0xff] }
 0x212   :  { %697 = vmatpush2.msra.mxu0 %v642_v49  ;;  %v780_v49 = vld [vmem:[#allocation2 + $0xbb0] sm:$0xff] }
 0x213   :  { %698 = vmatprep.subr.mxu0 %v641_v50  ;;  %v779_v50 = vld [vmem:[#allocation2 + $0xba8] sm:$0xff] }
 0x214   :  { %699 = vmatpush2.msra.mxu0 %v640_v51  ;;  %v778_v51 = vld [vmem:[#allocation2 + $0xba0] sm:$0xff] }
 0x215   :  { %700 = vmatprep.subr.mxu0 %v639_v52  ;;  %v777_v52 = vld [vmem:[#allocation2 + $0xb98] sm:$0xff] }
 0x216   :  { %701 = vmatpush2.msra.mxu0 %v638_v53  ;;  %v776_v53 = vld [vmem:[#allocation2 + $0xb90] sm:$0xff] }
 0x217   :  { %702 = vmatprep.subr.mxu0 %v637_v54  ;;  %v775_v54 = vld [vmem:[#allocation2 + $0xb88] sm:$0xff] }
 0x218   :  { %703 = vmatpush2.msra.mxu0 %v636_v55  ;;  %v774_v55 = vld [vmem:[#allocation2 + $0xb80] sm:$0xff] }
 0x219   :  { %704 = vmatprep.subr.mxu0 %v635_v56  ;;  %v773_v56 = vld [vmem:[#allocation2 + $0xb78] sm:$0xff] }
 0x21a   :  { %705 = vmatpush2.msra.mxu0 %v634_v57  ;;  %v772_v57 = vld [vmem:[#allocation2 + $0xb70] sm:$0xff] }
 0x21b   :  { %706 = vmatprep.subr.mxu0 %v633_v58  ;;  %v771_v58 = vld [vmem:[#allocation2 + $0xb68] sm:$0xff] }
 0x21c   :  { %707 = vmatpush2.msra.mxu0 %v632_v59  ;;  %v770_v59 = vld [vmem:[#allocation2 + $0xb60] sm:$0xff] }
 0x21d   :  { %708 = vmatprep.subr.mxu0 %v631_v60  ;;  %v769_v60 = vld [vmem:[#allocation2 + $0xb58] sm:$0xff] }
 0x21e   :  { %709 = vmatpush2.msra.mxu0 %v630_v61  ;;  %v768_v61 = vld [vmem:[#allocation2 + $0xb50] sm:$0xff] }
 0x21f   :  { %710 = vmatprep.subr.mxu0 %v629_v62  ;;  %v767_v62 = vld [vmem:[#allocation2 + $0xb48] sm:$0xff] }
 0x220   :  { %711 = vmatpush2.msra.mxu0 %v628_v63  ;;  %v766_v63 = vld [vmem:[#allocation2 + $0xb40] sm:$0xff] }
 0x221   :  { %712 = vmatprep.subr.mxu0 %v627_v0  ;;  %v765_v0 = vld [vmem:[#allocation2 + $0xb38] sm:$0xff] }
 0x222   :  { %713 = vmatpush2.msra.mxu0 %v626_v1  ;;  %v764_v1 = vld [vmem:[#allocation2 + $0xb30] sm:$0xff] }
 0x223   :  { %714 = vmatprep.subr.mxu0 %v625_v4 }
 0x224   :  { %715 = vmatpush2.msra.mxu0 %v624_v5 }
 0x225   :  { %716 = vmatprep.subr.mxu0 %v623_v6  ;;  %v761_v6 = vld [vmem:[#allocation2 + $0xb18] sm:$0xff] }
 0x226   :  { %717 = vmatpush2.msra.mxu0 %v622_v7  ;;  %v760_v7 = vld [vmem:[#allocation2 + $0xb10] sm:$0xff] }
 0x2a7   :  { %v448_v2 = vpop.f32.mrf.mxu0 }
 0x2a9   :  { %v450_v3 = vpop.f32.mrf.mxu0 }
 0x2aa   :  { %582 = vmatprep.mubr.f32.mxu1 %v450_v3  ;;  %v762_v3 = vld [vmem:[#allocation2 + $0xb20] sm:$0xff] }
 0x2ab   :  { %583 = vmatmul.mubr.f32.vlgmr.msra.gmra.mxu1 %v448_v2  ;;  %v763_v2 = vld [vmem:[#allocation2 + $0xb28] sm:$0xff] }
 0x2ac   :  { %791 = vmatpush1.msra.mxu1 %v756_v9  ;;  %v758_v9 = vld [vmem:[#allocation2 + $0xb00] sm:$0xff] }
 0x2ad   :  { %792 = vmatprep.subr.mxu1 %v755_v10  ;;  %v893_v10 = vld [vmem:[#allocation2 + $0xcf8] sm:$0xff] }
 0x2ae   :  { %793 = vmatpush1.msra.mxu1 %v754_v11  ;;  %v892_v11 = vld [vmem:[#allocation2 + $0xcf0] sm:$0xff]  ;;  %926 = vmatprep.subr.mxu0 %v893_v10  ;;  %v895_v10 = vld [vmem:[#allocation2 + $0xd08] sm:$0xff] }
 0x2af   :  { %794 = vmatprep.subr.mxu1 %v753_v12  ;;  %v891_v12 = vld [vmem:[#allocation2 + $0xce8] sm:$0xff] }
 0x2b0   :  { %795 = vmatpush1.msra.mxu1 %v752_v13  ;;  %v890_v13 = vld [vmem:[#allocation2 + $0xce0] sm:$0xff] }
 0x2b1   :  { %796 = vmatprep.subr.mxu1 %v751_v14  ;;  %v889_v14 = vld [vmem:[#allocation2 + $0xcd8] sm:$0xff] }
 0x2b2   :  { %797 = vmatpush1.msra.mxu1 %v750_v15  ;;  %v888_v15 = vld [vmem:[#allocation2 + $0xcd0] sm:$0xff] }
 0x2b3   :  { %798 = vmatprep.subr.mxu1 %v749_v16  ;;  %v887_v16 = vld [vmem:[#allocation2 + $0xcc8] sm:$0xff] }
 0x2b4   :  { %799 = vmatpush1.msra.mxu1 %v748_v17  ;;  %v886_v17 = vld [vmem:[#allocation2 + $0xcc0] sm:$0xff] }
 0x2b5   :  { %800 = vmatprep.subr.mxu1 %v747_v18  ;;  %v885_v18 = vld [vmem:[#allocation2 + $0xcb8] sm:$0xff] }
 0x2b6   :  { %801 = vmatpush1.msra.mxu1 %v746_v19  ;;  %v884_v19 = vld [vmem:[#allocation2 + $0xcb0] sm:$0xff] }
 0x2b7   :  { %802 = vmatprep.subr.mxu1 %v745_v20  ;;  %v883_v20 = vld [vmem:[#allocation2 + $0xca8] sm:$0xff] }
 0x2b8   :  { %803 = vmatpush1.msra.mxu1 %v744_v21  ;;  %v882_v21 = vld [vmem:[#allocation2 + $0xca0] sm:$0xff] }
 0x2b9   :  { %804 = vmatprep.subr.mxu1 %v743_v22  ;;  %v881_v22 = vld [vmem:[#allocation2 + $0xc98] sm:$0xff] }
 0x2ba   :  { %805 = vmatpush1.msra.mxu1 %v742_v23  ;;  %v880_v23 = vld [vmem:[#allocation2 + $0xc90] sm:$0xff] }
 0x2bb   :  { %806 = vmatprep.subr.mxu1 %v741_v24  ;;  %v879_v24 = vld [vmem:[#allocation2 + $0xc88] sm:$0xff] }
 0x2bc   :  { %807 = vmatpush1.msra.mxu1 %v740_v25  ;;  %v878_v25 = vld [vmem:[#allocation2 + $0xc80] sm:$0xff] }
 0x2bd   :  { %808 = vmatprep.subr.mxu1 %v739_v26  ;;  %v877_v26 = vld [vmem:[#allocation2 + $0xc78] sm:$0xff] }
 0x2be   :  { %809 = vmatpush1.msra.mxu1 %v738_v27  ;;  %v876_v27 = vld [vmem:[#allocation2 + $0xc70] sm:$0xff] }
 0x2bf   :  { %810 = vmatprep.subr.mxu1 %v737_v28  ;;  %v875_v28 = vld [vmem:[#allocation2 + $0xc68] sm:$0xff] }
 0x2c0   :  { %811 = vmatpush1.msra.mxu1 %v736_v29  ;;  %v874_v29 = vld [vmem:[#allocation2 + $0xc60] sm:$0xff] }
 0x2c1   :  { %812 = vmatprep.subr.mxu1 %v735_v30  ;;  %v873_v30 = vld [vmem:[#allocation2 + $0xc58] sm:$0xff] }
 0x2c2   :  { %813 = vmatpush1.msra.mxu1 %v734_v31  ;;  %v872_v31 = vld [vmem:[#allocation2 + $0xc50] sm:$0xff] }
 0x2c3   :  { %814 = vmatprep.subr.mxu1 %v733_v32  ;;  %v871_v32 = vld [vmem:[#allocation2 + $0xc48] sm:$0xff] }
 0x2c4   :  { %815 = vmatpush1.msra.mxu1 %v732_v33  ;;  %v870_v33 = vld [vmem:[#allocation2 + $0xc40] sm:$0xff] }
 0x2c5   :  { %816 = vmatprep.subr.mxu1 %v731_v34  ;;  %v869_v34 = vld [vmem:[#allocation2 + $0xc38] sm:$0xff] }
 0x2c6   :  { %817 = vmatpush1.msra.mxu1 %v730_v35  ;;  %v868_v35 = vld [vmem:[#allocation2 + $0xc30] sm:$0xff] }
 0x2c7   :  { %818 = vmatprep.subr.mxu1 %v729_v36  ;;  %v867_v36 = vld [vmem:[#allocation2 + $0xc28] sm:$0xff] }
 0x2c8   :  { %819 = vmatpush1.msra.mxu1 %v728_v37  ;;  %v866_v37 = vld [vmem:[#allocation2 + $0xc20] sm:$0xff] }
 0x2c9   :  { %820 = vmatprep.subr.mxu1 %v727_v38  ;;  %v865_v38 = vld [vmem:[#allocation2 + $0xc18] sm:$0xff] }
 0x2ca   :  { %821 = vmatpush1.msra.mxu1 %v726_v39  ;;  %v864_v39 = vld [vmem:[#allocation2 + $0xc10] sm:$0xff] }
 0x2cb   :  { %822 = vmatprep.subr.mxu1 %v789_v40  ;;  %v863_v40 = vld [vmem:[#allocation2 + $0xc08] sm:$0xff] }
 0x2cc   :  { %823 = vmatpush2.msra.mxu1 %v788_v41  ;;  %v862_v41 = vld [vmem:[#allocation2 + $0xc00] sm:$0xff] }
 0x2cd   :  { %824 = vmatprep.subr.mxu1 %v787_v42  ;;  %v925_v42 = vld [vmem:[#allocation2 + $0xdf8] sm:$0xff] }
 0x2ce   :  { %825 = vmatpush2.msra.mxu1 %v786_v43  ;;  %v924_v43 = vld [vmem:[#allocation2 + $0xdf0] sm:$0xff] }
 0x2cf   :  { %826 = vmatprep.subr.mxu1 %v785_v44  ;;  %v923_v44 = vld [vmem:[#allocation2 + $0xde8] sm:$0xff] }
 0x2d0   :  { %827 = vmatpush2.msra.mxu1 %v784_v45  ;;  %v922_v45 = vld [vmem:[#allocation2 + $0xde0] sm:$0xff] }
 0x2d1   :  { %828 = vmatprep.subr.mxu1 %v783_v46  ;;  %v921_v46 = vld [vmem:[#allocation2 + $0xdd8] sm:$0xff] }
 0x2d2   :  { %829 = vmatpush2.msra.mxu1 %v782_v47  ;;  %v920_v47 = vld [vmem:[#allocation2 + $0xdd0] sm:$0xff] }
 0x2d3   :  { %830 = vmatprep.subr.mxu1 %v781_v48  ;;  %v919_v48 = vld [vmem:[#allocation2 + $0xdc8] sm:$0xff] }
 0x2d4   :  { %831 = vmatpush2.msra.mxu1 %v780_v49  ;;  %v918_v49 = vld [vmem:[#allocation2 + $0xdc0] sm:$0xff] }
 0x2d5   :  { %832 = vmatprep.subr.mxu1 %v779_v50  ;;  %v917_v50 = vld [vmem:[#allocation2 + $0xdb8] sm:$0xff] }
 0x2d6   :  { %833 = vmatpush2.msra.mxu1 %v778_v51  ;;  %v916_v51 = vld [vmem:[#allocation2 + $0xdb0] sm:$0xff] }
 0x2d7   :  { %834 = vmatprep.subr.mxu1 %v777_v52  ;;  %v915_v52 = vld [vmem:[#allocation2 + $0xda8] sm:$0xff] }
 0x2d8   :  { %835 = vmatpush2.msra.mxu1 %v776_v53  ;;  %v914_v53 = vld [vmem:[#allocation2 + $0xda0] sm:$0xff] }
 0x2d9   :  { %836 = vmatprep.subr.mxu1 %v775_v54  ;;  %v913_v54 = vld [vmem:[#allocation2 + $0xd98] sm:$0xff] }
 0x2da   :  { %837 = vmatpush2.msra.mxu1 %v774_v55  ;;  %v912_v55 = vld [vmem:[#allocation2 + $0xd90] sm:$0xff] }
 0x2db   :  { %838 = vmatprep.subr.mxu1 %v773_v56  ;;  %v911_v56 = vld [vmem:[#allocation2 + $0xd88] sm:$0xff] }
 0x2dc   :  { %839 = vmatpush2.msra.mxu1 %v772_v57  ;;  %v910_v57 = vld [vmem:[#allocation2 + $0xd80] sm:$0xff] }
 0x2dd   :  { %840 = vmatprep.subr.mxu1 %v771_v58  ;;  %v909_v58 = vld [vmem:[#allocation2 + $0xd78] sm:$0xff] }
 0x2de   :  { %841 = vmatpush2.msra.mxu1 %v770_v59  ;;  %v908_v59 = vld [vmem:[#allocation2 + $0xd70] sm:$0xff] }
 0x2df   :  { %842 = vmatprep.subr.mxu1 %v769_v60  ;;  %v907_v60 = vld [vmem:[#allocation2 + $0xd68] sm:$0xff] }
 0x2e0   :  { %843 = vmatpush2.msra.mxu1 %v768_v61  ;;  %v906_v61 = vld [vmem:[#allocation2 + $0xd60] sm:$0xff] }
 0x2e1   :  { %844 = vmatprep.subr.mxu1 %v767_v62  ;;  %v905_v62 = vld [vmem:[#allocation2 + $0xd58] sm:$0xff] }
 0x2e2   :  { %845 = vmatpush2.msra.mxu1 %v766_v63  ;;  %v904_v63 = vld [vmem:[#allocation2 + $0xd50] sm:$0xff] }
 0x2e3   :  { %846 = vmatprep.subr.mxu1 %v765_v0  ;;  %v903_v0 = vld [vmem:[#allocation2 + $0xd48] sm:$0xff] }
 0x2e4   :  { %847 = vmatpush2.msra.mxu1 %v764_v1  ;;  %v902_v1 = vld [vmem:[#allocation2 + $0xd40] sm:$0xff] }
 0x2e5   :  { %848 = vmatprep.subr.mxu1 %v763_v2  ;;  %v901_v2 = vld [vmem:[#allocation2 + $0xd38] sm:$0xff] }
 0x2e6   :  { %849 = vmatpush2.msra.mxu1 %v762_v3  ;;  %v900_v3 = vld [vmem:[#allocation2 + $0xd30] sm:$0xff] }
 0x2e7   :  { %850 = vmatprep.subr.mxu1 %v761_v6 }
 0x2e8   :  { %851 = vmatpush2.msra.mxu1 %v760_v7 }
 0x2e9   :  { %852 = vmatprep.subr.mxu1 %v759_v8  ;;  %v897_v8 = vld [vmem:[#allocation2 + $0xd18] sm:$0xff] }
 0x2ea   :  { %853 = vmatpush2.msra.mxu1 %v758_v9  ;;  %v896_v9 = vld [vmem:[#allocation2 + $0xd10] sm:$0xff] }
 0x36b   :  { %v584_v4 = vpop.f32.mrf.mxu1 }
 0x36d   :  { %v586_v5 = vpop.f32.mrf.mxu1 }
 0x36e   :  { %718 = vmatprep.mubr.f32.mxu0 %v586_v5  ;;  %v898_v5 = vld [vmem:[#allocation2 + $0xd20] sm:$0xff] }
 0x36f   :  { %719 = vmatmul.mubr.f32.vlgmr.msra.gmra.mxu0 %v584_v4  ;;  %v899_v4 = vld [vmem:[#allocation2 + $0xd28] sm:$0xff] }
 0x370   :  { %927 = vmatpush1.msra.mxu0 %v892_v11  ;;  %v894_v11 = vld [vmem:[#allocation2 + $0xd00] sm:$0xff] }
 0x371   :  { %928 = vmatprep.subr.mxu0 %v891_v12 }
 0x372   :  { %929 = vmatpush1.msra.mxu0 %v890_v13 }
 0x373   :  { %930 = vmatprep.subr.mxu0 %v889_v14 }
 0x374   :  { %931 = vmatpush1.msra.mxu0 %v888_v15 }
 0x375   :  { %932 = vmatprep.subr.mxu0 %v887_v16 }
 0x376   :  { %933 = vmatpush1.msra.mxu0 %v886_v17 }
 0x377   :  { %934 = vmatprep.subr.mxu0 %v885_v18 }
 0x378   :  { %935 = vmatpush1.msra.mxu0 %v884_v19 }
 0x379   :  { %936 = vmatprep.subr.mxu0 %v883_v20 }
 0x37a   :  { %937 = vmatpush1.msra.mxu0 %v882_v21 }
 0x37b   :  { %938 = vmatprep.subr.mxu0 %v881_v22 }
 0x37c   :  { %939 = vmatpush1.msra.mxu0 %v880_v23 }
 0x37d   :  { %940 = vmatprep.subr.mxu0 %v879_v24 }
 0x37e   :  { %941 = vmatpush1.msra.mxu0 %v878_v25 }
 0x37f   :  { %942 = vmatprep.subr.mxu0 %v877_v26 }
 0x380   :  { %943 = vmatpush1.msra.mxu0 %v876_v27 }
 0x381   :  { %944 = vmatprep.subr.mxu0 %v875_v28 }
 0x382   :  { %945 = vmatpush1.msra.mxu0 %v874_v29 }
 0x383   :  { %946 = vmatprep.subr.mxu0 %v873_v30 }
 0x384   :  { %947 = vmatpush1.msra.mxu0 %v872_v31 }
 0x385   :  { %948 = vmatprep.subr.mxu0 %v871_v32 }
 0x386   :  { %949 = vmatpush1.msra.mxu0 %v870_v33 }
 0x387   :  { %950 = vmatprep.subr.mxu0 %v869_v34 }
 0x388   :  { %951 = vmatpush1.msra.mxu0 %v868_v35 }
 0x389   :  { %952 = vmatprep.subr.mxu0 %v867_v36 }
 0x38a   :  { %953 = vmatpush1.msra.mxu0 %v866_v37 }
 0x38b   :  { %954 = vmatprep.subr.mxu0 %v865_v38 }
 0x38c   :  { %955 = vmatpush1.msra.mxu0 %v864_v39 }
 0x38d   :  { %956 = vmatprep.subr.mxu0 %v863_v40 }
 0x38e   :  { %957 = vmatpush1.msra.mxu0 %v862_v41 }
 0x38f   :  { %958 = vmatprep.subr.mxu0 %v925_v42 }
 0x390   :  { %959 = vmatpush2.msra.mxu0 %v924_v43 }
 0x391   :  { %960 = vmatprep.subr.mxu0 %v923_v44 }
 0x392   :  { %961 = vmatpush2.msra.mxu0 %v922_v45 }
 0x393   :  { %962 = vmatprep.subr.mxu0 %v921_v46 }
 0x394   :  { %963 = vmatpush2.msra.mxu0 %v920_v47 }
 0x395   :  { %964 = vmatprep.subr.mxu0 %v919_v48 }
 0x396   :  { %965 = vmatpush2.msra.mxu0 %v918_v49 }
 0x397   :  { %966 = vmatprep.subr.mxu0 %v917_v50 }
 0x398   :  { %967 = vmatpush2.msra.mxu0 %v916_v51 }
 0x399   :  { %968 = vmatprep.subr.mxu0 %v915_v52 }
 0x39a   :  { %969 = vmatpush2.msra.mxu0 %v914_v53 }
 0x39b   :  { %970 = vmatprep.subr.mxu0 %v913_v54 }
 0x39c   :  { %971 = vmatpush2.msra.mxu0 %v912_v55 }
 0x39d   :  { %972 = vmatprep.subr.mxu0 %v911_v56 }
 0x39e   :  { %973 = vmatpush2.msra.mxu0 %v910_v57 }
 0x39f   :  { %974 = vmatprep.subr.mxu0 %v909_v58 }
 0x3a0   :  { %975 = vmatpush2.msra.mxu0 %v908_v59 }
 0x3a1   :  { %976 = vmatprep.subr.mxu0 %v907_v60 }
 0x3a2   :  { %977 = vmatpush2.msra.mxu0 %v906_v61 }
 0x3a3   :  { %978 = vmatprep.subr.mxu0 %v905_v62 }
 0x3a4   :  { %979 = vmatpush2.msra.mxu0 %v904_v63 }
 0x3a5   :  { %980 = vmatprep.subr.mxu0 %v903_v0 }
 0x3a6   :  { %981 = vmatpush2.msra.mxu0 %v902_v1 }
 0x3a7   :  { %982 = vmatprep.subr.mxu0 %v901_v2 }
 0x3a8   :  { %983 = vmatpush2.msra.mxu0 %v900_v3 }
 0x3a9   :  { %984 = vmatprep.subr.mxu0 %v899_v4 }
 0x3aa   :  { %985 = vmatpush2.msra.mxu0 %v898_v5 }
 0x3ab   :  { %986 = vmatprep.subr.mxu0 %v897_v8 }
 0x3ac   :  { %987 = vmatpush2.msra.mxu0 %v896_v9 }
 0x3ad   :  { %988 = vmatprep.subr.mxu0 %v895_v10 }
 0x3ae   :  { %989 = vmatpush2.msra.mxu0 %v894_v11 }
 0x42f   :  { %v720_v6 = vpop.f32.mrf.mxu0 }
 0x431   :  { %v722_v7 = vpop.f32.mrf.mxu0 }
 0x432   :  { %854 = vmatprep.mubr.f32.mxu1 %v722_v7 }
 0x433   :  { %855 = vmatmul.mubr.f32.vlgmr.msra.gmra.mxu1 %v720_v6 }
 0x4f3   :  { %v856_v12 = vpop.f32.mrf.mxu1 }
 0x4f5   :  { %v858_v13 = vpop.f32.mrf.mxu1 }
 0x4f6   :  { %990 = vmatprep.mubr.f32.mxu0 %v858_v13 }
 0x4f7   :  { %991 = vmatmul.mubr.f32.vlgmr.msra.gmra.mxu0 %v856_v12 }
 0x5b7   :  { %v992_v14 = vpop.f32.mrf.mxu0 }
 0x5b8   :  { %997 = vst [vmem:[#allocation7] sm:$0xff] %v992_v14  ;;  %v1000_v16 = vmul.f32 %v992_v14, %v992_v14 }
 0x5b9   :  { %v994_v15 = vpop.f32.mrf.mxu0 }
 0x5ba   :  { %999 = vst [vmem:[#allocation7 + $0x8] sm:$0xff] %v994_v15  ;;  %v1001_v17 = vmul.f32 %v994_v15, %v994_v15 }
 0x5bb   :  { %1095 = shalt.err (!%p1092_p0)
}
 0x5bc   :  { %1015 = dma.vmem_to_hbm [thread:$0]  %s1010_s1, 256, %s1180_s2, [#allocation4], %s1136_s22, %s1136_s22, %s1137_s23   ;;  %v1002_v18 = vadd.f32 %v1001_v17, %v1000_v16 }
 0x5bd   :  { %s1104_s4 = scalar_lea.vmem %s1023_s27, 128  ;;  %p1109_p2 = scmp.lt.s32.totalorder %s1023_s27, %s1023_s27 }
 0x5be   :  { %1003 = vst [vmem:[#allocation8] sm:$0xff] %v1002_v18  ;;  %p1105_p1 = scmp.ne.s32.totalorder %s1023_s27, %s1104_s4  ;;  %p1110_p3 = scmp.lt.s32.totalorder %s1104_s4, %s1104_s4 }
 0x5c0   :  { %p1111_p4 = por %p1110_p3, %p1109_p2 }
 0x5c2   :  { %p1112_p5 = pnand %p1111_p4, %p1105_p1 }
 0x5c4   :  { %1115 = shalt.err (!%p1112_p5)
}
 0x5c5   :  { %1025 = dma.vmem_to_hbm [thread:$0]  %s1023_s27, 128, %s1181_s3, [#allocation9]  }
 0x5c6   :  { %1128 = dma.done.wait [#allocation4], 256  }
 0x5c7   :  { %1129 = vsyncadd [#allocation4], 4294967040 }
 0x5c8   :  { %1130 = dma.done.wait [#allocation9], 128  }
 0x5c9   :  { %1131 = vsyncadd [#allocation9], 4294967168 }
 0x5ca   :  { %1032 = vsyncpa [#allocation3], 1 }
 0x5cb   :  { %1033 = vsyncpa [#allocation6], 1 }
 0x5cc   :  { %1034 = vsyncpa [#allocation4], 1 }
 0x5cd   :  { %1035 = vsyncpa [#allocation9], 1 }

</bundles_post_ra>
